<compile_context>
chip_gen: v7x
topology: tpu7x:2x2x1
jax: 0.10.0
libtpu: 0.0.40
codegen_flags: <defaults>
</compile_context>

<pallas_src>
import functools
import math

import jax
import jax.numpy as jnp
from jax import lax
from jax.experimental import pallas as pl
from jax.experimental.pallas import tpu as pltpu


def _layernorm(x, gamma, beta, eps=1e-6):
    # x: (T, E) f32, gamma/beta: (1, E) f32; biased variance like torch.nn.LayerNorm.
    mean = jnp.mean(x, axis=-1, keepdims=True)
    var = jnp.mean((x - mean) ** 2, axis=-1, keepdims=True)
    return (x - mean) * lax.rsqrt(var + eps) * gamma + beta


def transformer_block_kernel(
    q_ref, k_ref, v_ref, bias_ref,
    wq_ref, bq_ref, wk_ref, bk_ref, wv_ref, bv_ref,
    wfc_ref, bfc_ref,
    g1_ref, be1_ref, w1_ref, b1_ref, w2_ref, b2_ref, g2_ref, be2_ref,
    o_ref,
    ks_ref, vs_ref,
    *, heads, head_dim,
):
    tq = q_ref.shape[1]
    emb = bfc_ref.shape[1]

    qx = q_ref[0]                    # (tq, E) f32 — residual input
    bias = bias_ref[0]               # (tq, S) f32 — additive mask bias (-1e20 at masked)

    # --- K/V projections: one fat (S,E)@(E,E) bf16 matmul each, computed once per batch
    #     element (q-tile grid axis is sequential/"arbitrary") and cached in VMEM scratch.
    @pl.when(pl.program_id(1) == 0)
    def _():
        kx = k_ref[0].astype(jnp.bfloat16)
        vx = v_ref[0].astype(jnp.bfloat16)
        ks = jnp.dot(kx, wk_ref[...], preferred_element_type=jnp.float32) + bk_ref[...]
        vs = jnp.dot(vx, wv_ref[...], preferred_element_type=jnp.float32) + bv_ref[...]
        ks_ref[...] = ks.astype(jnp.bfloat16)
        vs_ref[...] = vs.astype(jnp.bfloat16)

    # --- Q projection (1/sqrt(emb_dim) softmax scale already folded into wq/bq glue-side).
    qs = jnp.dot(qx.astype(jnp.bfloat16), wq_ref[...],
                 preferred_element_type=jnp.float32) + bq_ref[...]
    qs = qs.astype(jnp.bfloat16)     # (tq, E)

    ks = ks_ref[...]                 # (S, E) bf16
    vs = vs_ref[...]                 # (S, E) bf16

    # --- per-head attention; accumulate head_out @ Wfc[h] instead of concatenating heads.
    acc = jnp.zeros((tq, emb), jnp.float32)
    for h in range(heads):           # static unroll over heads
        lo = h * head_dim
        qh = qs[:, lo:lo + head_dim]            # (tq, hd) bf16
        kh = ks[:, lo:lo + head_dim]            # (S,  hd) bf16
        vh = vs[:, lo:lo + head_dim]            # (S,  hd) bf16
        # scores = qh @ kh^T  (already scaled), plus hoisted additive mask bias
        scores = lax.dot_general(qh, kh, (((1,), (1,)), ((), ())),
                                 preferred_element_type=jnp.float32) + bias   # (tq, S)
        m = jnp.max(scores, axis=-1, keepdims=True)
        e = jnp.exp(scores - m)
        attn = e * pl.reciprocal(jnp.sum(e, axis=-1, keepdims=True), approx=True)
        head_out = jnp.dot(attn.astype(jnp.bfloat16), vh,
                           preferred_element_type=jnp.float32)                # (tq, hd)
        acc = acc + jnp.dot(head_out.astype(jnp.bfloat16), wfc_ref[h],
                            preferred_element_type=jnp.float32)               # (tq, E)
    att = acc + bfc_ref[...]

    # TODO(synk): dropout omitted (eval-mode identity; training-mode dropout is stochastic)
    x = _layernorm(att + qx, g1_ref[...], be1_ref[...])           # norm1 + residual

    h1 = jnp.dot(x.astype(jnp.bfloat16), w1_ref[...],
                 preferred_element_type=jnp.float32) + b1_ref[...]
    h1 = jnp.maximum(h1, 0.0).astype(jnp.bfloat16)
    ffn = jnp.dot(h1, w2_ref[...], preferred_element_type=jnp.float32) + b2_ref[...]

    o_ref[0] = _layernorm(ffn + x, g2_ref[...], be2_ref[...])     # norm2 + residual


def _spectral_normalize(w):
    # w: PyTorch-layout (out, in). Divide by the exact largest singular value.
    sigma = jnp.linalg.svd(w, compute_uv=False)[0]
    return w / sigma


def init_params(key, emb_dim, n_heads, forward_dim):
    head_dim = emb_dim // n_heads
    ks = jax.random.split(key, 12)

    def linear(kw, kb, fan_in, fan_out):
        bound = 1.0 / math.sqrt(fan_in)
        w = jax.random.uniform(kw, (fan_out, fan_in), jnp.float32, -bound, bound)
        b = jax.random.uniform(kb, (fan_out,), jnp.float32, -bound, bound)
        return w, b

    wq, bq = linear(ks[0], ks[1], head_dim, head_dim)
    wk, bk = linear(ks[2], ks[3], head_dim, head_dim)
    wv, bv = linear(ks[4], ks[5], head_dim, head_dim)
    wfc, bfc = linear(ks[6], ks[7], emb_dim, emb_dim)
    w1, b1 = linear(ks[8], ks[9], emb_dim, forward_dim)
    w2, b2 = linear(ks[10], ks[11], forward_dim, emb_dim)

    # spectral=True: normalize attention + ffn linear weights
    wq, wk, wv, wfc = map(_spectral_normalize, (wq, wk, wv, wfc))
    w1, w2 = map(_spectral_normalize, (w1, w2))

    return dict(
        # transposed to (in, out) for x @ W; biases / LN params as (1, N) rows
        wq=wq.T, bq=bq[None, :], wk=wk.T, bk=bk[None, :], wv=wv.T, bv=bv[None, :],
        wfc=wfc.T, bfc=bfc[None, :],
        g1=jnp.ones((1, emb_dim), jnp.float32), be1=jnp.zeros((1, emb_dim), jnp.float32),
        g2=jnp.ones((1, emb_dim), jnp.float32), be2=jnp.zeros((1, emb_dim), jnp.float32),
        w1=w1.T, b1=b1[None, :], w2=w2.T, b2=b2[None, :],
    )


def transformer_block(query, key, value, mask, params, *, n_heads):
    B, S, E = query.shape
    head_dim = E // n_heads
    F = params["w1"].shape[1]
    scale = 1.0 / math.sqrt(float(E))
    bf16 = jnp.bfloat16

    # q-row tiling: bounds per-step VMEM ((tq,S) score temporaries, (tq,F) FFN rows) and
    # gives the grid a second axis for pipelining at large S.
    tq = 128 if S % 128 == 0 else S
    nq = S // tq

    # ---- glue-side parameter prep -------------------------------------------------
    # Block-diagonal per-head Q/K/V weights -> one full-width (E,E) matmul per projection.
    eye = jnp.eye(n_heads, dtype=jnp.float32)
    wq_bd = (jnp.kron(eye, params["wq"]) * scale).astype(bf16)     # scale folded into Wq
    wk_bd = jnp.kron(eye, params["wk"]).astype(bf16)
    wv_bd = jnp.kron(eye, params["wv"]).astype(bf16)
    bq_t = jnp.tile(params["bq"], (1, n_heads)) * scale            # (1, E) f32
    bk_t = jnp.tile(params["bk"], (1, n_heads))
    bv_t = jnp.tile(params["bv"], (1, n_heads))
    wfc3 = params["wfc"].reshape(n_heads, head_dim, E).astype(bf16)  # per-head FC slices
    w1_b = params["w1"].astype(bf16)
    w2_b = params["w2"].astype(bf16)

    # Hoisted mask handling: additive bias computed once in the wrapper.
    mask_b = jnp.broadcast_to(mask, (B, 1, S, S))[:, 0]
    mask_bias = jnp.where(mask_b == 0, jnp.float32(-1e20), jnp.float32(0.0))  # (B, S, S)

    param_arrays = [
        wq_bd, bq_t, wk_bd, bk_t, wv_bd, bv_t, wfc3, params["bfc"],
        params["g1"], params["be1"], w1_b, params["b1"], w2_b, params["b2"],
        params["g2"], params["be2"],
    ]

    def full_spec(arr):
        nd = arr.ndim
        return pl.BlockSpec(arr.shape, lambda b, qi, _nd=nd: (0,) * _nd)

    q_spec = pl.BlockSpec((1, tq, E), lambda b, qi: (b, qi, 0))
    kv_spec = pl.BlockSpec((1, S, E), lambda b, qi: (b, 0, 0))     # resident across q tiles
    bias_spec = pl.BlockSpec((1, tq, S), lambda b, qi: (b, qi, 0))
    out_spec = pl.BlockSpec((1, tq, E), lambda b, qi: (b, qi, 0))

    kernel = functools.partial(transformer_block_kernel,
                               heads=n_heads, head_dim=head_dim)

    flops = int(B * (8 * S * E * E + 4 * S * S * E + 4 * S * E * F))
    transcendentals = int(B * n_heads * S * S)
    bytes_accessed = int(
        4 * B * S * E * 4                      # q, k, v, out (f32)
        + 4 * B * S * S                        # mask bias (f32)
        + 2 * (4 * E * E + 2 * E * F)          # bf16 weights
        + 4 * (8 * E + 2 * F)                  # f32 biases / LN params (approx)
    )

    return pl.pallas_call(
        kernel,
        out_shape=jax.ShapeDtypeStruct((B, S, E), jnp.float32),
        grid_spec=pltpu.PrefetchScalarGridSpec(
            num_scalar_prefetch=0,
            grid=(B, nq),
            in_specs=[q_spec, kv_spec, kv_spec, bias_spec]
                     + [full_spec(a) for a in param_arrays],
            out_specs=out_spec,
            scratch_shapes=[pltpu.VMEM((S, E), jnp.bfloat16),   # projected K (cached)
                            pltpu.VMEM((S, E), jnp.bfloat16)],  # projected V (cached)
        ),
        compiler_params=pltpu.CompilerParams(
            dimension_semantics=("parallel", "arbitrary"),
            vmem_limit_bytes=32 * 1024 * 1024,
        ),
        cost_estimate=pl.CostEstimate(
            flops=flops, transcendentals=transcendentals, bytes_accessed=bytes_accessed),
    )(query, key, value, mask_bias, *param_arrays)


def reference_jax(query, key, value, mask, params, *, n_heads):
    """Plain-JAX f32 reference of the same forward pass (PyTorch semantics)."""
    B, S, E = query.shape
    hd = E // n_heads
    q4 = query.reshape(B, S, n_heads, hd)
    k4 = key.reshape(B, S, n_heads, hd)
    v4 = value.reshape(B, S, n_heads, hd)
    Q = q4 @ params["wq"] + params["bq"][0]
    K = k4 @ params["wk"] + params["bk"][0]
    V = v4 @ params["wv"] + params["bv"][0]
    scores = jnp.einsum("nqhd,nkhd->nhqk", Q, K)
    scores = jnp.where(mask == 0, -1e20, scores)
    attn = jax.nn.softmax(scores / math.sqrt(E), axis=3)
    out = jnp.einsum("nhql,nlhd->nqhd", attn, V).reshape(B, S, E)
    att = out @ params["wfc"] + params["bfc"][0]

    def ln(x, g, b):
        m = jnp.mean(x, -1, keepdims=True)
        var = jnp.mean((x - m) ** 2, -1, keepdims=True)
        return (x - m) / jnp.sqrt(var + 1e-6) * g + b

    x = ln(att + query, params["g1"][0], params["be1"][0])
    h1 = jax.nn.relu(x @ params["w1"] + params["b1"][0])
    ffn = h1 @ params["w2"] + params["b2"][0]
    return ln(ffn + x, params["g2"][0], params["be2"][0])


if __name__ == "__main__":
    B, S, E, H, F = 2, 8, 32, 4, 64

    root = jax.random.PRNGKey(0)
    k_in, k_par = jax.random.split(root)
    kq, kk, kv = jax.random.split(k_in, 3)
    query = jax.random.normal(kq, (B, S, E), jnp.float32)
    key = jax.random.normal(kk, (B, S, E), jnp.float32)
    value = jax.random.normal(kv, (B, S, E), jnp.float32)
    # Causal mask (broadcast over heads) — exercises the masking path; no fully-masked row.
    mask = jnp.broadcast_to(jnp.tril(jnp.ones((S, S), jnp.float32)), (B, 1, S, S))

    params = init_params(k_par, E, H, F)

    out = jax.block_until_ready(
        transformer_block(query, key, value, mask, params, n_heads=H))
    ref = reference_jax(query, key, value, mask, params, n_heads=H)

    assert out.shape == (B, S, E)
    # Kernel uses bf16 MXU matmuls + approx-reciprocal softmax; compare against the f32
    # reference with a bf16-appropriate tolerance.
    max_diff = float(jnp.max(jnp.abs(out - ref)))
    assert jnp.allclose(out, ref, atol=7.5e-2, rtol=7.5e-2), (
        f"mismatch vs JAX reference (max abs diff = {max_diff})")
    print("KERNEL_OK")
</pallas_src>

<mosaic_0001>
module attributes {stable_mosaic.version = 11 : i64} {
  func.func @transformer_block_kernel(%arg0: i32, %arg1: i32, %arg2: memref<1x8x32xf32, #tpu.memory_space<vmem>>, %arg3: memref<1x8x32xf32, #tpu.memory_space<vmem>>, %arg4: memref<1x8x32xf32, #tpu.memory_space<vmem>>, %arg5: memref<1x8x8xf32, #tpu.memory_space<vmem>>, %arg6: memref<32x32xbf16, #tpu.memory_space<vmem>>, %arg7: memref<1x32xf32, #tpu.memory_space<vmem>>, %arg8: memref<32x32xbf16, #tpu.memory_space<vmem>>, %arg9: memref<1x32xf32, #tpu.memory_space<vmem>>, %arg10: memref<32x32xbf16, #tpu.memory_space<vmem>>, %arg11: memref<1x32xf32, #tpu.memory_space<vmem>>, %arg12: memref<4x8x32xbf16, #tpu.memory_space<vmem>>, %arg13: memref<1x32xf32, #tpu.memory_space<vmem>>, %arg14: memref<1x32xf32, #tpu.memory_space<vmem>>, %arg15: memref<1x32xf32, #tpu.memory_space<vmem>>, %arg16: memref<32x64xbf16, #tpu.memory_space<vmem>>, %arg17: memref<1x64xf32, #tpu.memory_space<vmem>>, %arg18: memref<64x32xbf16, #tpu.memory_space<vmem>>, %arg19: memref<1x32xf32, #tpu.memory_space<vmem>>, %arg20: memref<1x32xf32, #tpu.memory_space<vmem>>, %arg21: memref<1x32xf32, #tpu.memory_space<vmem>>, %arg22: memref<1x8x32xf32, #tpu.memory_space<vmem>>, %arg23: memref<8x32xbf16, #tpu.memory_space<vmem>>, %arg24: memref<8x32xbf16, #tpu.memory_space<vmem>>) attributes {dimension_semantics = [#tpu.dimension_semantics<parallel>, #tpu.dimension_semantics<arbitrary>], iteration_bounds = array<i64: 2, 1>, scalar_prefetch = 0 : i64, scratch_operands = 2 : i64, tpu.core_type = #tpu.core_type<tc>, window_params = [{transform_indices = @transform_0, window_bounds = array<i64: 1, 8, 32>}, {transform_indices = @transform_1, window_bounds = array<i64: 1, 8, 32>}, {transform_indices = @transform_2, window_bounds = array<i64: 1, 8, 32>}, {transform_indices = @transform_3, window_bounds = array<i64: 1, 8, 8>}, {pipeline_mode = #tpu.pipeline_mode<synchronous>, transform_indices = @transform_4, window_bounds = array<i64: 32, 32>}, {pipeline_mode = #tpu.pipeline_mode<synchronous>, transform_indices = @transform_5, window_bounds = array<i64: 1, 32>}, {pipeline_mode = #tpu.pipeline_mode<synchronous>, transform_indices = @transform_6, window_bounds = array<i64: 32, 32>}, {pipeline_mode = #tpu.pipeline_mode<synchronous>, transform_indices = @transform_7, window_bounds = array<i64: 1, 32>}, {pipeline_mode = #tpu.pipeline_mode<synchronous>, transform_indices = @transform_8, window_bounds = array<i64: 32, 32>}, {pipeline_mode = #tpu.pipeline_mode<synchronous>, transform_indices = @transform_9, window_bounds = array<i64: 1, 32>}, {pipeline_mode = #tpu.pipeline_mode<synchronous>, transform_indices = @transform_10, window_bounds = array<i64: 4, 8, 32>}, {pipeline_mode = #tpu.pipeline_mode<synchronous>, transform_indices = @transform_11, window_bounds = array<i64: 1, 32>}, {pipeline_mode = #tpu.pipeline_mode<synchronous>, transform_indices = @transform_12, window_bounds = array<i64: 1, 32>}, {pipeline_mode = #tpu.pipeline_mode<synchronous>, transform_indices = @transform_13, window_bounds = array<i64: 1, 32>}, {pipeline_mode = #tpu.pipeline_mode<synchronous>, transform_indices = @transform_14, window_bounds = array<i64: 32, 64>}, {pipeline_mode = #tpu.pipeline_mode<synchronous>, transform_indices = @transform_15, window_bounds = array<i64: 1, 64>}, {pipeline_mode = #tpu.pipeline_mode<synchronous>, transform_indices = @transform_16, window_bounds = array<i64: 64, 32>}, {pipeline_mode = #tpu.pipeline_mode<synchronous>, transform_indices = @transform_17, window_bounds = array<i64: 1, 32>}, {pipeline_mode = #tpu.pipeline_mode<synchronous>, transform_indices = @transform_18, window_bounds = array<i64: 1, 32>}, {pipeline_mode = #tpu.pipeline_mode<synchronous>, transform_indices = @transform_19, window_bounds = array<i64: 1, 32>}, {transform_indices = @transform_20, window_bounds = array<i64: 1, 8, 32>}]} {
    %c0 = arith.constant 0 : index
    %c0_0 = arith.constant 0 : index
    %c0_1 = arith.constant 0 : index
    %0 = vector.load %arg2[%c0, %c0_0, %c0_1] : memref<1x8x32xf32, #tpu.memory_space<vmem>>, vector<1x8x32xf32>
    %1 = vector.shape_cast %0 : vector<1x8x32xf32> to vector<8x32xf32>
    %c0_2 = arith.constant 0 : index
    %c0_3 = arith.constant 0 : index
    %c0_4 = arith.constant 0 : index
    %2 = vector.load %arg5[%c0_2, %c0_3, %c0_4] : memref<1x8x8xf32, #tpu.memory_space<vmem>>, vector<1x8x8xf32>
    %3 = vector.shape_cast %2 : vector<1x8x8xf32> to vector<8x8xf32>
    %c0_i32 = arith.constant 0 : i32
    %4 = arith.cmpi eq, %arg1, %c0_i32 : i32
    %5 = arith.extui %4 : i1 to i32
    %c0_i32_5 = arith.constant 0 : i32
    %6 = arith.cmpi ne, %5, %c0_i32_5 : i32
    scf.if %6 {
      %c0_78 = arith.constant 0 : index
      %c0_79 = arith.constant 0 : index
      %c0_80 = arith.constant 0 : index
      %175 = vector.load %arg3[%c0_78, %c0_79, %c0_80] : memref<1x8x32xf32, #tpu.memory_space<vmem>>, vector<1x8x32xf32>
      %176 = vector.shape_cast %175 : vector<1x8x32xf32> to vector<8x32xf32>
      %177 = arith.truncf %176 : vector<8x32xf32> to vector<8x32xbf16>
      %c0_81 = arith.constant 0 : index
      %c0_82 = arith.constant 0 : index
      %c0_83 = arith.constant 0 : index
      %178 = vector.load %arg4[%c0_81, %c0_82, %c0_83] : memref<1x8x32xf32, #tpu.memory_space<vmem>>, vector<1x8x32xf32>
      %179 = vector.shape_cast %178 : vector<1x8x32xf32> to vector<8x32xf32>
      %180 = arith.truncf %179 : vector<8x32xf32> to vector<8x32xbf16>
      %c0_84 = arith.constant 0 : index
      %c0_85 = arith.constant 0 : index
      %181 = vector.load %arg8[%c0_84, %c0_85] : memref<32x32xbf16, #tpu.memory_space<vmem>>, vector<32x32xbf16>
      %cst_86 = arith.constant dense<0.000000e+00> : vector<8x32xf32>
      %182 = tpu.matmul %177, %181, %cst_86 {dimension_numbers = #tpu.dot_dimension_numbers<[1], [0], [0], [1], [0, 0, 1, 1], [], []>} : vector<8x32xbf16>, vector<32x32xbf16>, vector<8x32xf32> -> vector<8x32xf32>
      %c0_87 = arith.constant 0 : index
      %c0_88 = arith.constant 0 : index
      %183 = vector.load %arg9[%c0_87, %c0_88] : memref<1x32xf32, #tpu.memory_space<vmem>>, vector<1x32xf32>
      %184 = vector.broadcast %183 : vector<1x32xf32> to vector<8x32xf32>
      %185 = arith.addf %182, %184 : vector<8x32xf32>
      %c0_89 = arith.constant 0 : index
      %c0_90 = arith.constant 0 : index
      %186 = vector.load %arg10[%c0_89, %c0_90] : memref<32x32xbf16, #tpu.memory_space<vmem>>, vector<32x32xbf16>
      %cst_91 = arith.constant dense<0.000000e+00> : vector<8x32xf32>
      %187 = tpu.matmul %180, %186, %cst_91 {dimension_numbers = #tpu.dot_dimension_numbers<[1], [0], [0], [1], [0, 0, 1, 1], [], []>} : vector<8x32xbf16>, vector<32x32xbf16>, vector<8x32xf32> -> vector<8x32xf32>
      %c0_92 = arith.constant 0 : index
      %c0_93 = arith.constant 0 : index
      %188 = vector.load %arg11[%c0_92, %c0_93] : memref<1x32xf32, #tpu.memory_space<vmem>>, vector<1x32xf32>
      %189 = vector.broadcast %188 : vector<1x32xf32> to vector<8x32xf32>
      %190 = arith.addf %187, %189 : vector<8x32xf32>
      %191 = arith.truncf %185 : vector<8x32xf32> to vector<8x32xbf16>
      %c0_94 = arith.constant 0 : index
      %c0_95 = arith.constant 0 : index
      %192 = vector.load %arg23[%c0_94, %c0_95] : memref<8x32xbf16, #tpu.memory_space<vmem>>, vector<8x32xbf16>
      tpu.vector_store %arg23[%c0_94, %c0_95], %191 {strides = array<i32>} : memref<8x32xbf16, #tpu.memory_space<vmem>>, vector<8x32xbf16>,
      %193 = arith.truncf %190 : vector<8x32xf32> to vector<8x32xbf16>
      %c0_96 = arith.constant 0 : index
      %c0_97 = arith.constant 0 : index
      %194 = vector.load %arg24[%c0_96, %c0_97] : memref<8x32xbf16, #tpu.memory_space<vmem>>, vector<8x32xbf16>
      tpu.vector_store %arg24[%c0_96, %c0_97], %193 {strides = array<i32>} : memref<8x32xbf16, #tpu.memory_space<vmem>>, vector<8x32xbf16>,
    } else {
    }
    %7 = arith.truncf %1 : vector<8x32xf32> to vector<8x32xbf16>
    %c0_6 = arith.constant 0 : index
    %c0_7 = arith.constant 0 : index
    %8 = vector.load %arg6[%c0_6, %c0_7] : memref<32x32xbf16, #tpu.memory_space<vmem>>, vector<32x32xbf16>
    %cst = arith.constant dense<0.000000e+00> : vector<8x32xf32>
    %9 = tpu.matmul %7, %8, %cst {dimension_numbers = #tpu.dot_dimension_numbers<[1], [0], [0], [1], [0, 0, 1, 1], [], []>} : vector<8x32xbf16>, vector<32x32xbf16>, vector<8x32xf32> -> vector<8x32xf32>
    %c0_8 = arith.constant 0 : index
    %c0_9 = arith.constant 0 : index
    %10 = vector.load %arg7[%c0_8, %c0_9] : memref<1x32xf32, #tpu.memory_space<vmem>>, vector<1x32xf32>
    %11 = vector.broadcast %10 : vector<1x32xf32> to vector<8x32xf32>
    %12 = arith.addf %9, %11 : vector<8x32xf32>
    %13 = arith.truncf %12 : vector<8x32xf32> to vector<8x32xbf16>
    %c0_10 = arith.constant 0 : index
    %c0_11 = arith.constant 0 : index
    %14 = vector.load %arg23[%c0_10, %c0_11] : memref<8x32xbf16, #tpu.memory_space<vmem>>, vector<8x32xbf16>
    %c0_12 = arith.constant 0 : index
    %c0_13 = arith.constant 0 : index
    %15 = vector.load %arg24[%c0_12, %c0_13] : memref<8x32xbf16, #tpu.memory_space<vmem>>, vector<8x32xbf16>
    %cst_14 = arith.constant 0.000000e+00 : f32
    %16 = vector.broadcast %cst_14 : f32 to vector<8x32xf32>
    %17 = vector.extract_strided_slice %13 {offsets = [0, 0], sizes = [8, 8], strides = [1, 1]} : vector<8x32xbf16> to vector<8x8xbf16>
    %18 = vector.extract_strided_slice %14 {offsets = [0, 0], sizes = [8, 8], strides = [1, 1]} : vector<8x32xbf16> to vector<8x8xbf16>
    %19 = vector.extract_strided_slice %15 {offsets = [0, 0], sizes = [8, 8], strides = [1, 1]} : vector<8x32xbf16> to vector<8x8xbf16>
    %cst_15 = arith.constant dense<0.000000e+00> : vector<8x8xf32>
    %20 = tpu.matmul %17, %18, %cst_15 {dimension_numbers = #tpu.dot_dimension_numbers<[1], [1], [0], [0], [0, 0, 1, 0], [], []>} : vector<8x8xbf16>, vector<8x8xbf16>, vector<8x8xf32> -> vector<8x8xf32>
    %21 = arith.addf %20, %3 : vector<8x8xf32>
    %cst_16 = arith.constant dense<0xFF800000> : vector<8xf32>
    %22 = vector.multi_reduction <maximumf>, %21, %cst_16 [1] : vector<8x8xf32> to vector<8xf32>
    %23 = vector.shape_cast %22 : vector<8xf32> to vector<8x1xf32>
    %24 = vector.broadcast %23 : vector<8x1xf32> to vector<8x8xf32>
    %25 = arith.subf %21, %24 : vector<8x8xf32>
    %26 = math.exp %25 : vector<8x8xf32>
    %cst_17 = arith.constant dense<0.000000e+00> : vector<8xf32>
    %27 = vector.multi_reduction <add>, %26, %cst_17 [1] : vector<8x8xf32> to vector<8xf32>
    %28 = vector.shape_cast %27 : vector<8xf32> to vector<8x1xf32>
    %29 = tpu.reciprocal %28 {approx = true} : vector<8x1xf32> -> vector<8x1xf32>
    %30 = vector.broadcast %29 : vector<8x1xf32> to vector<8x8xf32>
    %31 = arith.mulf %26, %30 : vector<8x8xf32>
    %32 = arith.truncf %31 : vector<8x8xf32> to vector<8x8xbf16>
    %cst_18 = arith.constant dense<0.000000e+00> : vector<8x8xf32>
    %33 = tpu.matmul %32, %19, %cst_18 {dimension_numbers = #tpu.dot_dimension_numbers<[1], [0], [0], [1], [0, 0, 1, 1], [], []>} : vector<8x8xbf16>, vector<8x8xbf16>, vector<8x8xf32> -> vector<8x8xf32>
    %34 = arith.truncf %33 : vector<8x8xf32> to vector<8x8xbf16>
    %c0_19 = arith.constant 0 : index
    %c0_20 = arith.constant 0 : index
    %c0_21 = arith.constant 0 : index
    %35 = vector.load %arg12[%c0_19, %c0_20, %c0_21] : memref<4x8x32xbf16, #tpu.memory_space<vmem>>, vector<1x8x32xbf16>
    %36 = vector.shape_cast %35 : vector<1x8x32xbf16> to vector<8x32xbf16>
    %cst_22 = arith.constant dense<0.000000e+00> : vector<8x32xf32>
    %37 = tpu.matmul %34, %36, %cst_22 {dimension_numbers = #tpu.dot_dimension_numbers<[1], [0], [0], [1], [0, 0, 1, 1], [], []>} : vector<8x8xbf16>, vector<8x32xbf16>, vector<8x32xf32> -> vector<8x32xf32>
    %38 = arith.addf %16, %37 : vector<8x32xf32>
    %39 = vector.extract_strided_slice %13 {offsets = [0, 8], sizes = [8, 8], strides = [1, 1]} : vector<8x32xbf16> to vector<8x8xbf16>
    %40 = vector.extract_strided_slice %14 {offsets = [0, 8], sizes = [8, 8], strides = [1, 1]} : vector<8x32xbf16> to vector<8x8xbf16>
    %41 = vector.extract_strided_slice %15 {offsets = [0, 8], sizes = [8, 8], strides = [1, 1]} : vector<8x32xbf16> to vector<8x8xbf16>
    %cst_23 = arith.constant dense<0.000000e+00> : vector<8x8xf32>
    %42 = tpu.matmul %39, %40, %cst_23 {dimension_numbers = #tpu.dot_dimension_numbers<[1], [1], [0], [0], [0, 0, 1, 0], [], []>} : vector<8x8xbf16>, vector<8x8xbf16>, vector<8x8xf32> -> vector<8x8xf32>
    %43 = arith.addf %42, %3 : vector<8x8xf32>
    %cst_24 = arith.constant dense<0xFF800000> : vector<8xf32>
    %44 = vector.multi_reduction <maximumf>, %43, %cst_24 [1] : vector<8x8xf32> to vector<8xf32>
    %45 = vector.shape_cast %44 : vector<8xf32> to vector<8x1xf32>
    %46 = vector.broadcast %45 : vector<8x1xf32> to vector<8x8xf32>
    %47 = arith.subf %43, %46 : vector<8x8xf32>
    %48 = math.exp %47 : vector<8x8xf32>
    %cst_25 = arith.constant dense<0.000000e+00> : vector<8xf32>
    %49 = vector.multi_reduction <add>, %48, %cst_25 [1] : vector<8x8xf32> to vector<8xf32>
    %50 = vector.shape_cast %49 : vector<8xf32> to vector<8x1xf32>
    %51 = tpu.reciprocal %50 {approx = true} : vector<8x1xf32> -> vector<8x1xf32>
    %52 = vector.broadcast %51 : vector<8x1xf32> to vector<8x8xf32>
    %53 = arith.mulf %48, %52 : vector<8x8xf32>
    %54 = arith.truncf %53 : vector<8x8xf32> to vector<8x8xbf16>
    %cst_26 = arith.constant dense<0.000000e+00> : vector<8x8xf32>
    %55 = tpu.matmul %54, %41, %cst_26 {dimension_numbers = #tpu.dot_dimension_numbers<[1], [0], [0], [1], [0, 0, 1, 1], [], []>} : vector<8x8xbf16>, vector<8x8xbf16>, vector<8x8xf32> -> vector<8x8xf32>
    %56 = arith.truncf %55 : vector<8x8xf32> to vector<8x8xbf16>
    %c1 = arith.constant 1 : index
    %c0_27 = arith.constant 0 : index
    %c0_28 = arith.constant 0 : index
    %57 = vector.load %arg12[%c1, %c0_27, %c0_28] : memref<4x8x32xbf16, #tpu.memory_space<vmem>>, vector<1x8x32xbf16>
    %58 = vector.shape_cast %57 : vector<1x8x32xbf16> to vector<8x32xbf16>
    %cst_29 = arith.constant dense<0.000000e+00> : vector<8x32xf32>
    %59 = tpu.matmul %56, %58, %cst_29 {dimension_numbers = #tpu.dot_dimension_numbers<[1], [0], [0], [1], [0, 0, 1, 1], [], []>} : vector<8x8xbf16>, vector<8x32xbf16>, vector<8x32xf32> -> vector<8x32xf32>
    %60 = arith.addf %38, %59 : vector<8x32xf32>
    %61 = vector.extract_strided_slice %13 {offsets = [0, 16], sizes = [8, 8], strides = [1, 1]} : vector<8x32xbf16> to vector<8x8xbf16>
    %62 = vector.extract_strided_slice %14 {offsets = [0, 16], sizes = [8, 8], strides = [1, 1]} : vector<8x32xbf16> to vector<8x8xbf16>
    %63 = vector.extract_strided_slice %15 {offsets = [0, 16], sizes = [8, 8], strides = [1, 1]} : vector<8x32xbf16> to vector<8x8xbf16>
    %cst_30 = arith.constant dense<0.000000e+00> : vector<8x8xf32>
    %64 = tpu.matmul %61, %62, %cst_30 {dimension_numbers = #tpu.dot_dimension_numbers<[1], [1], [0], [0], [0, 0, 1, 0], [], []>} : vector<8x8xbf16>, vector<8x8xbf16>, vector<8x8xf32> -> vector<8x8xf32>
    %65 = arith.addf %64, %3 : vector<8x8xf32>
    %cst_31 = arith.constant dense<0xFF800000> : vector<8xf32>
    %66 = vector.multi_reduction <maximumf>, %65, %cst_31 [1] : vector<8x8xf32> to vector<8xf32>
    %67 = vector.shape_cast %66 : vector<8xf32> to vector<8x1xf32>
    %68 = vector.broadcast %67 : vector<8x1xf32> to vector<8x8xf32>
    %69 = arith.subf %65, %68 : vector<8x8xf32>
    %70 = math.exp %69 : vector<8x8xf32>
    %cst_32 = arith.constant dense<0.000000e+00> : vector<8xf32>
    %71 = vector.multi_reduction <add>, %70, %cst_32 [1] : vector<8x8xf32> to vector<8xf32>
    %72 = vector.shape_cast %71 : vector<8xf32> to vector<8x1xf32>
    %73 = tpu.reciprocal %72 {approx = true} : vector<8x1xf32> -> vector<8x1xf32>
    %74 = vector.broadcast %73 : vector<8x1xf32> to vector<8x8xf32>
    %75 = arith.mulf %70, %74 : vector<8x8xf32>
    %76 = arith.truncf %75 : vector<8x8xf32> to vector<8x8xbf16>
    %cst_33 = arith.constant dense<0.000000e+00> : vector<8x8xf32>
    %77 = tpu.matmul %76, %63, %cst_33 {dimension_numbers = #tpu.dot_dimension_numbers<[1], [0], [0], [1], [0, 0, 1, 1], [], []>} : vector<8x8xbf16>, vector<8x8xbf16>, vector<8x8xf32> -> vector<8x8xf32>
    %78 = arith.truncf %77 : vector<8x8xf32> to vector<8x8xbf16>
    %c2 = arith.constant 2 : index
    %c0_34 = arith.constant 0 : index
    %c0_35 = arith.constant 0 : index
    %79 = vector.load %arg12[%c2, %c0_34, %c0_35] : memref<4x8x32xbf16, #tpu.memory_space<vmem>>, vector<1x8x32xbf16>
    %80 = vector.shape_cast %79 : vector<1x8x32xbf16> to vector<8x32xbf16>
    %cst_36 = arith.constant dense<0.000000e+00> : vector<8x32xf32>
    %81 = tpu.matmul %78, %80, %cst_36 {dimension_numbers = #tpu.dot_dimension_numbers<[1], [0], [0], [1], [0, 0, 1, 1], [], []>} : vector<8x8xbf16>, vector<8x32xbf16>, vector<8x32xf32> -> vector<8x32xf32>
    %82 = arith.addf %60, %81 : vector<8x32xf32>
    %83 = vector.extract_strided_slice %13 {offsets = [0, 24], sizes = [8, 8], strides = [1, 1]} : vector<8x32xbf16> to vector<8x8xbf16>
    %84 = vector.extract_strided_slice %14 {offsets = [0, 24], sizes = [8, 8], strides = [1, 1]} : vector<8x32xbf16> to vector<8x8xbf16>
    %85 = vector.extract_strided_slice %15 {offsets = [0, 24], sizes = [8, 8], strides = [1, 1]} : vector<8x32xbf16> to vector<8x8xbf16>
    %cst_37 = arith.constant dense<0.000000e+00> : vector<8x8xf32>
    %86 = tpu.matmul %83, %84, %cst_37 {dimension_numbers = #tpu.dot_dimension_numbers<[1], [1], [0], [0], [0, 0, 1, 0], [], []>} : vector<8x8xbf16>, vector<8x8xbf16>, vector<8x8xf32> -> vector<8x8xf32>
    %87 = arith.addf %86, %3 : vector<8x8xf32>
    %cst_38 = arith.constant dense<0xFF800000> : vector<8xf32>
    %88 = vector.multi_reduction <maximumf>, %87, %cst_38 [1] : vector<8x8xf32> to vector<8xf32>
    %89 = vector.shape_cast %88 : vector<8xf32> to vector<8x1xf32>
    %90 = vector.broadcast %89 : vector<8x1xf32> to vector<8x8xf32>
    %91 = arith.subf %87, %90 : vector<8x8xf32>
    %92 = math.exp %91 : vector<8x8xf32>
    %cst_39 = arith.constant dense<0.000000e+00> : vector<8xf32>
    %93 = vector.multi_reduction <add>, %92, %cst_39 [1] : vector<8x8xf32> to vector<8xf32>
    %94 = vector.shape_cast %93 : vector<8xf32> to vector<8x1xf32>
    %95 = tpu.reciprocal %94 {approx = true} : vector<8x1xf32> -> vector<8x1xf32>
    %96 = vector.broadcast %95 : vector<8x1xf32> to vector<8x8xf32>
    %97 = arith.mulf %92, %96 : vector<8x8xf32>
    %98 = arith.truncf %97 : vector<8x8xf32> to vector<8x8xbf16>
    %cst_40 = arith.constant dense<0.000000e+00> : vector<8x8xf32>
    %99 = tpu.matmul %98, %85, %cst_40 {dimension_numbers = #tpu.dot_dimension_numbers<[1], [0], [0], [1], [0, 0, 1, 1], [], []>} : vector<8x8xbf16>, vector<8x8xbf16>, vector<8x8xf32> -> vector<8x8xf32>
    %100 = arith.truncf %99 : vector<8x8xf32> to vector<8x8xbf16>
    %c3 = arith.constant 3 : index
    %c0_41 = arith.constant 0 : index
    %c0_42 = arith.constant 0 : index
    %101 = vector.load %arg12[%c3, %c0_41, %c0_42] : memref<4x8x32xbf16, #tpu.memory_space<vmem>>, vector<1x8x32xbf16>
    %102 = vector.shape_cast %101 : vector<1x8x32xbf16> to vector<8x32xbf16>
    %cst_43 = arith.constant dense<0.000000e+00> : vector<8x32xf32>
    %103 = tpu.matmul %100, %102, %cst_43 {dimension_numbers = #tpu.dot_dimension_numbers<[1], [0], [0], [1], [0, 0, 1, 1], [], []>} : vector<8x8xbf16>, vector<8x32xbf16>, vector<8x32xf32> -> vector<8x32xf32>
    %104 = arith.addf %82, %103 : vector<8x32xf32>
    %c0_44 = arith.constant 0 : index
    %c0_45 = arith.constant 0 : index
    %105 = vector.load %arg13[%c0_44, %c0_45] : memref<1x32xf32, #tpu.memory_space<vmem>>, vector<1x32xf32>
    %106 = vector.broadcast %105 : vector<1x32xf32> to vector<8x32xf32>
    %107 = arith.addf %104, %106 : vector<8x32xf32>
    %108 = arith.addf %107, %1 : vector<8x32xf32>
    %c0_46 = arith.constant 0 : index
    %c0_47 = arith.constant 0 : index
    %109 = vector.load %arg14[%c0_46, %c0_47] : memref<1x32xf32, #tpu.memory_space<vmem>>, vector<1x32xf32>
    %c0_48 = arith.constant 0 : index
    %c0_49 = arith.constant 0 : index
    %110 = vector.load %arg15[%c0_48, %c0_49] : memref<1x32xf32, #tpu.memory_space<vmem>>, vector<1x32xf32>
    %cst_50 = arith.constant dense<0.000000e+00> : vector<8xf32>
    %111 = vector.multi_reduction <add>, %108, %cst_50 [1] : vector<8x32xf32> to vector<8xf32>
    %112 = vector.shape_cast %111 : vector<8xf32> to vector<8x1xf32>
    %cst_51 = arith.constant 3.200000e+01 : f32
    %113 = vector.broadcast %cst_51 : f32 to vector<8x1xf32>
    %114 = arith.divf %112, %113 : vector<8x1xf32>
    %115 = vector.broadcast %114 : vector<8x1xf32> to vector<8x32xf32>
    %116 = arith.subf %108, %115 : vector<8x32xf32>
    %117 = arith.mulf %116, %116 : vector<8x32xf32>
    %cst_52 = arith.constant dense<0.000000e+00> : vector<8xf32>
    %118 = vector.multi_reduction <add>, %117, %cst_52 [1] : vector<8x32xf32> to vector<8xf32>
    %119 = vector.shape_cast %118 : vector<8xf32> to vector<8x1xf32>
    %cst_53 = arith.constant 3.200000e+01 : f32
    %120 = vector.broadcast %cst_53 : f32 to vector<8x1xf32>
    %121 = arith.divf %119, %120 : vector<8x1xf32>
    %122 = vector.broadcast %114 : vector<8x1xf32> to vector<8x32xf32>
    %123 = arith.subf %108, %122 : vector<8x32xf32>
    %cst_54 = arith.constant 9.99999997E-7 : f32
    %124 = vector.broadcast %cst_54 : f32 to vector<8x1xf32>
    %125 = arith.addf %121, %124 : vector<8x1xf32>
    %126 = math.rsqrt %125 : vector<8x1xf32>
    %127 = vector.broadcast %126 : vector<8x1xf32> to vector<8x32xf32>
    %128 = arith.mulf %123, %127 : vector<8x32xf32>
    %129 = vector.broadcast %109 : vector<1x32xf32> to vector<8x32xf32>
    %130 = arith.mulf %128, %129 : vector<8x32xf32>
    %131 = vector.broadcast %110 : vector<1x32xf32> to vector<8x32xf32>
    %132 = arith.addf %130, %131 : vector<8x32xf32>
    %133 = arith.truncf %132 : vector<8x32xf32> to vector<8x32xbf16>
    %c0_55 = arith.constant 0 : index
    %c0_56 = arith.constant 0 : index
    %134 = vector.load %arg16[%c0_55, %c0_56] : memref<32x64xbf16, #tpu.memory_space<vmem>>, vector<32x64xbf16>
    %cst_57 = arith.constant dense<0.000000e+00> : vector<8x64xf32>
    %135 = tpu.matmul %133, %134, %cst_57 {dimension_numbers = #tpu.dot_dimension_numbers<[1], [0], [0], [1], [0, 0, 1, 1], [], []>} : vector<8x32xbf16>, vector<32x64xbf16>, vector<8x64xf32> -> vector<8x64xf32>
    %c0_58 = arith.constant 0 : index
    %c0_59 = arith.constant 0 : index
    %136 = vector.load %arg17[%c0_58, %c0_59] : memref<1x64xf32, #tpu.memory_space<vmem>>, vector<1x64xf32>
    %137 = vector.broadcast %136 : vector<1x64xf32> to vector<8x64xf32>
    %138 = arith.addf %135, %137 : vector<8x64xf32>
    %cst_60 = arith.constant 0.000000e+00 : f32
    %139 = vector.broadcast %cst_60 : f32 to vector<8x64xf32>
    %140 = arith.maximumf %138, %139 : vector<8x64xf32>
    %141 = arith.truncf %140 : vector<8x64xf32> to vector<8x64xbf16>
    %c0_61 = arith.constant 0 : index
    %c0_62 = arith.constant 0 : index
    %142 = vector.load %arg18[%c0_61, %c0_62] : memref<64x32xbf16, #tpu.memory_space<vmem>>, vector<64x32xbf16>
    %cst_63 = arith.constant dense<0.000000e+00> : vector<8x32xf32>
    %143 = tpu.matmul %141, %142, %cst_63 {dimension_numbers = #tpu.dot_dimension_numbers<[1], [0], [0], [1], [0, 0, 1, 1], [], []>} : vector<8x64xbf16>, vector<64x32xbf16>, vector<8x32xf32> -> vector<8x32xf32>
    %c0_64 = arith.constant 0 : index
    %c0_65 = arith.constant 0 : index
    %144 = vector.load %arg19[%c0_64, %c0_65] : memref<1x32xf32, #tpu.memory_space<vmem>>, vector<1x32xf32>
    %145 = vector.broadcast %144 : vector<1x32xf32> to vector<8x32xf32>
    %146 = arith.addf %143, %145 : vector<8x32xf32>
    %147 = arith.addf %146, %132 : vector<8x32xf32>
    %c0_66 = arith.constant 0 : index
    %c0_67 = arith.constant 0 : index
    %148 = vector.load %arg20[%c0_66, %c0_67] : memref<1x32xf32, #tpu.memory_space<vmem>>, vector<1x32xf32>
    %c0_68 = arith.constant 0 : index
    %c0_69 = arith.constant 0 : index
    %149 = vector.load %arg21[%c0_68, %c0_69] : memref<1x32xf32, #tpu.memory_space<vmem>>, vector<1x32xf32>
    %cst_70 = arith.constant dense<0.000000e+00> : vector<8xf32>
    %150 = vector.multi_reduction <add>, %147, %cst_70 [1] : vector<8x32xf32> to vector<8xf32>
    %151 = vector.shape_cast %150 : vector<8xf32> to vector<8x1xf32>
    %cst_71 = arith.constant 3.200000e+01 : f32
    %152 = vector.broadcast %cst_71 : f32 to vector<8x1xf32>
    %153 = arith.divf %151, %152 : vector<8x1xf32>
    %154 = vector.broadcast %153 : vector<8x1xf32> to vector<8x32xf32>
    %155 = arith.subf %147, %154 : vector<8x32xf32>
    %156 = arith.mulf %155, %155 : vector<8x32xf32>
    %cst_72 = arith.constant dense<0.000000e+00> : vector<8xf32>
    %157 = vector.multi_reduction <add>, %156, %cst_72 [1] : vector<8x32xf32> to vector<8xf32>
    %158 = vector.shape_cast %157 : vector<8xf32> to vector<8x1xf32>
    %cst_73 = arith.constant 3.200000e+01 : f32
    %159 = vector.broadcast %cst_73 : f32 to vector<8x1xf32>
    %160 = arith.divf %158, %159 : vector<8x1xf32>
    %161 = vector.broadcast %153 : vector<8x1xf32> to vector<8x32xf32>
    %162 = arith.subf %147, %161 : vector<8x32xf32>
    %cst_74 = arith.constant 9.99999997E-7 : f32
    %163 = vector.broadcast %cst_74 : f32 to vector<8x1xf32>
    %164 = arith.addf %160, %163 : vector<8x1xf32>
    %165 = math.rsqrt %164 : vector<8x1xf32>
    %166 = vector.broadcast %165 : vector<8x1xf32> to vector<8x32xf32>
    %167 = arith.mulf %162, %166 : vector<8x32xf32>
    %168 = vector.broadcast %148 : vector<1x32xf32> to vector<8x32xf32>
    %169 = arith.mulf %167, %168 : vector<8x32xf32>
    %170 = vector.broadcast %149 : vector<1x32xf32> to vector<8x32xf32>
    %171 = arith.addf %169, %170 : vector<8x32xf32>
    %c0_75 = arith.constant 0 : index
    %c0_76 = arith.constant 0 : index
    %c0_77 = arith.constant 0 : index
    %172 = vector.load %arg22[%c0_75, %c0_76, %c0_77] : memref<1x8x32xf32, #tpu.memory_space<vmem>>, vector<1x8x32xf32>
    %173 = vector.shape_cast %172 : vector<1x8x32xf32> to vector<8x32xf32>
    %174 = vector.shape_cast %171 : vector<8x32xf32> to vector<1x8x32xf32>
    tpu.vector_store %arg22[%c0_75, %c0_76, %c0_77], %174 {strides = array<i32>} : memref<1x8x32xf32, #tpu.memory_space<vmem>>, vector<1x8x32xf32>,
    return
  }
  func.func @transform_0(%arg0: i32, %arg1: i32) -> (i32, i32, i32) {
    %c0_i32 = arith.constant 0 : i32
    %c0_i32_0 = arith.constant 0 : i32
    return %arg0, %arg1, %c0_i32 : i32, i32, i32
  }
  func.func @transform_1(%arg0: i32, %arg1: i32) -> (i32, i32, i32) {
    %c0_i32 = arith.constant 0 : i32
    %c0_i32_0 = arith.constant 0 : i32
    %c0_i32_1 = arith.constant 0 : i32
    return %arg0, %c0_i32, %c0_i32_0 : i32, i32, i32
  }
  func.func @transform_2(%arg0: i32, %arg1: i32) -> (i32, i32, i32) {
    %c0_i32 = arith.constant 0 : i32
    %c0_i32_0 = arith.constant 0 : i32
    %c0_i32_1 = arith.constant 0 : i32
    return %arg0, %c0_i32, %c0_i32_0 : i32, i32, i32
  }
  func.func @transform_3(%arg0: i32, %arg1: i32) -> (i32, i32, i32) {
    %c0_i32 = arith.constant 0 : i32
    %c0_i32_0 = arith.constant 0 : i32
    return %arg0, %arg1, %c0_i32 : i32, i32, i32
  }
  func.func @transform_4(%arg0: i32, %arg1: i32) -> (i32, i32) {
    %c0_i32 = arith.constant 0 : i32
    %c0_i32_0 = arith.constant 0 : i32
    %c0_i32_1 = arith.constant 0 : i32
    return %c0_i32, %c0_i32_0 : i32, i32
  }
  func.func @transform_5(%arg0: i32, %arg1: i32) -> (i32, i32) {
    %c0_i32 = arith.constant 0 : i32
    %c0_i32_0 = arith.constant 0 : i32
    %c0_i32_1 = arith.constant 0 : i32
    return %c0_i32, %c0_i32_0 : i32, i32
  }
  func.func @transform_6(%arg0: i32, %arg1: i32) -> (i32, i32) {
    %c0_i32 = arith.constant 0 : i32
    %c0_i32_0 = arith.constant 0 : i32
    %c0_i32_1 = arith.constant 0 : i32
    return %c0_i32, %c0_i32_0 : i32, i32
  }
  func.func @transform_7(%arg0: i32, %arg1: i32) -> (i32, i32) {
    %c0_i32 = arith.constant 0 : i32
    %c0_i32_0 = arith.constant 0 : i32
    %c0_i32_1 = arith.constant 0 : i32
    return %c0_i32, %c0_i32_0 : i32, i32
  }
  func.func @transform_8(%arg0: i32, %arg1: i32) -> (i32, i32) {
    %c0_i32 = arith.constant 0 : i32
    %c0_i32_0 = arith.constant 0 : i32
    %c0_i32_1 = arith.constant 0 : i32
    return %c0_i32, %c0_i32_0 : i32, i32
  }
  func.func @transform_9(%arg0: i32, %arg1: i32) -> (i32, i32) {
    %c0_i32 = arith.constant 0 : i32
    %c0_i32_0 = arith.constant 0 : i32
    %c0_i32_1 = arith.constant 0 : i32
    return %c0_i32, %c0_i32_0 : i32, i32
  }
  func.func @transform_10(%arg0: i32, %arg1: i32) -> (i32, i32, i32) {
    %c0_i32 = arith.constant 0 : i32
    %c0_i32_0 = arith.constant 0 : i32
    %c0_i32_1 = arith.constant 0 : i32
    %c0_i32_2 = arith.constant 0 : i32
    return %c0_i32, %c0_i32_0, %c0_i32_1 : i32, i32, i32
  }
  func.func @transform_11(%arg0: i32, %arg1: i32) -> (i32, i32) {
    %c0_i32 = arith.constant 0 : i32
    %c0_i32_0 = arith.constant 0 : i32
    %c0_i32_1 = arith.constant 0 : i32
    return %c0_i32, %c0_i32_0 : i32, i32
  }
  func.func @transform_12(%arg0: i32, %arg1: i32) -> (i32, i32) {
    %c0_i32 = arith.constant 0 : i32
    %c0_i32_0 = arith.constant 0 : i32
    %c0_i32_1 = arith.constant 0 : i32
    return %c0_i32, %c0_i32_0 : i32, i32
  }
  func.func @transform_13(%arg0: i32, %arg1: i32) -> (i32, i32) {
    %c0_i32 = arith.constant 0 : i32
    %c0_i32_0 = arith.constant 0 : i32
    %c0_i32_1 = arith.constant 0 : i32
    return %c0_i32, %c0_i32_0 : i32, i32
  }
  func.func @transform_14(%arg0: i32, %arg1: i32) -> (i32, i32) {
    %c0_i32 = arith.constant 0 : i32
    %c0_i32_0 = arith.constant 0 : i32
    %c0_i32_1 = arith.constant 0 : i32
    return %c0_i32, %c0_i32_0 : i32, i32
  }
  func.func @transform_15(%arg0: i32, %arg1: i32) -> (i32, i32) {
    %c0_i32 = arith.constant 0 : i32
    %c0_i32_0 = arith.constant 0 : i32
    %c0_i32_1 = arith.constant 0 : i32
    return %c0_i32, %c0_i32_0 : i32, i32
  }
  func.func @transform_16(%arg0: i32, %arg1: i32) -> (i32, i32) {
    %c0_i32 = arith.constant 0 : i32
    %c0_i32_0 = arith.constant 0 : i32
    %c0_i32_1 = arith.constant 0 : i32
    return %c0_i32, %c0_i32_0 : i32, i32
  }
  func.func @transform_17(%arg0: i32, %arg1: i32) -> (i32, i32) {
    %c0_i32 = arith.constant 0 : i32
    %c0_i32_0 = arith.constant 0 : i32
    %c0_i32_1 = arith.constant 0 : i32
    return %c0_i32, %c0_i32_0 : i32, i32
  }
  func.func @transform_18(%arg0: i32, %arg1: i32) -> (i32, i32) {
    %c0_i32 = arith.constant 0 : i32
    %c0_i32_0 = arith.constant 0 : i32
    %c0_i32_1 = arith.constant 0 : i32
    return %c0_i32, %c0_i32_0 : i32, i32
  }
  func.func @transform_19(%arg0: i32, %arg1: i32) -> (i32, i32) {
    %c0_i32 = arith.constant 0 : i32
    %c0_i32_0 = arith.constant 0 : i32
    %c0_i32_1 = arith.constant 0 : i32
    return %c0_i32, %c0_i32_0 : i32, i32
  }
  func.func @transform_20(%arg0: i32, %arg1: i32) -> (i32, i32, i32) {
    %c0_i32 = arith.constant 0 : i32
    %c0_i32_0 = arith.constant 0 : i32
    return %arg0, %arg1, %c0_i32 : i32, i32, i32
  }
}

</mosaic_0001>

<bundles_post_ra>
// kernel: tpu_custom_call.1
= control target key start
LH: loop header
LB: loop body
LE: loop exit
PB: predicated region body
PF: predicated region fallthrough
CT: control target
= control target key end

     0   :  { %s3605_s0 = inlined_call_operand.vmem [shape: f32[2,8,32], index: 0, kind: input, shape index: {}]   ;;  %s3606_s1 = inlined_call_operand.vmem [shape: f32[2,8,32], index: 1, kind: input, shape index: {}]   ;;  %s3607_s2 = inlined_call_operand.vmem [shape: f32[2,8,32], index: 2, kind: input, shape index: {}]   ;;  %s3608_s3 = inlined_call_operand.hbm [shape: f32[2,8,8], index: 3, kind: input, shape index: {}]   ;;  %s3609_s4 = inlined_call_operand.hbm [shape: bf16[32,32], index: 4, kind: input, shape index: {}]   ;;  %s3610_s5 = inlined_call_operand.vmem [shape: f32[1,32], index: 5, kind: input, shape index: {}]   ;;  %s3611_s6 = inlined_call_operand.hbm [shape: bf16[32,32], index: 6, kind: input, shape index: {}]   ;;  %s3612_s7 = inlined_call_operand.hbm [shape: f32[1,32], index: 7, kind: input, shape index: {}]   ;;  %s3613_s8 = inlined_call_operand.hbm [shape: bf16[32,32], index: 8, kind: input, shape index: {}]   ;;  %s3614_s9 = inlined_call_operand.hbm [shape: f32[1,32], index: 9, kind: input, shape index: {}]   ;;  %s3615_s10 = inlined_call_operand.vmem [shape: bf16[4,8,32], index: 10, kind: input, shape index: {}]   ;;  %s3616_s11 = inlined_call_operand.hbm [shape: f32[1,32], index: 11, kind: input, shape index: {}]   ;;  %s3617_s12 = inlined_call_operand.hbm [shape: f32[1,32], index: 12, kind: input, shape index: {}]   ;;  %s3618_s13 = inlined_call_operand.hbm [shape: f32[1,32], index: 13, kind: input, shape index: {}]   ;;  %s3619_s14 = inlined_call_operand.vmem [shape: bf16[32,64], index: 14, kind: input, shape index: {}]   ;;  %s3620_s15 = inlined_call_operand.vmem [shape: f32[1,64], index: 15, kind: input, shape index: {}]   ;;  %s3621_s16 = inlined_call_operand.vmem [shape: bf16[64,32], index: 16, kind: input, shape index: {}]   ;;  %s3622_s17 = inlined_call_operand.vmem [shape: f32[1,32], index: 17, kind: input, shape index: {}]   ;;  %s3623_s18 = inlined_call_operand.vmem [shape: f32[1,32], index: 18, kind: input, shape index: {}]   ;;  %s3624_s19 = inlined_call_operand.vmem [shape: f32[1,32], index: 19, kind: input, shape index: {}]   ;;  %s3625_s20 = inlined_call_operand.hbm [shape: f32[2,8,32], index: 20, kind: output, shape index: {}]  }
   0x1   :  { %3641 = sst [smem:[#allocation27_spill]] %s3605_s0 }
   0x2   :  { %3642 = sst [smem:[#allocation28_spill]] %s3606_s1 }
   0x3   :  { %3643 = sst [smem:[#allocation29_spill]] %s3607_s2 }
   0x4   :  { %3644 = sst [smem:[#allocation30_spill]] %s3608_s3 }
   0x5   :  { %3645 = sst [smem:[#allocation31_spill]] %s3609_s4 }
   0x6   :  { %3646 = sst [smem:[#allocation32_spill]] %s3610_s5 }
   0x7   :  { %3647 = sst [smem:[#allocation33_spill]] %s3611_s6 }
   0x8   :  { %3648 = sst [smem:[#allocation34_spill]] %s3612_s7 }
   0x9   :  { %3649 = sst [smem:[#allocation35_spill]] %s3613_s8 }
   0xa   :  { %3650 = sst [smem:[#allocation36_spill]] %s3614_s9 }
   0xb   :  { %3651 = sst [smem:[#allocation37_spill]] %s3615_s10 }
   0xc   :  { %3652 = sst [smem:[#allocation38_spill]] %s3616_s11 }
   0xd   :  { %3653 = sst [smem:[#allocation39_spill]] %s3619_s14 }
   0xe   :  { %3654 = sst [smem:[#allocation40_spill]] %s3620_s15 }
   0xf   :  { %3655 = sst [smem:[#allocation41_spill]] %s3621_s16 }
  0x10   :  { %3656 = sst [smem:[#allocation42_spill]] %s3622_s17 }
  0x11   :  { %3657 = sst [smem:[#allocation43_spill]] %s3623_s18 }
  0x12   :  { %3658 = sst [smem:[#allocation44_spill]] %s3624_s19 }
  0x13   :  { %3659 = sst [smem:[#allocation45_spill]] %s3625_s20 }
  0x14   :  { %25 = vsyncpa [#allocation5], 0 }
  0x15   :  { %27 = vsyncpa [#allocation5 + $0x1], 0 }
  0x16   :  { %28 = vsyncpa [#allocation8], 0 }
  0x17   :  { %29 = vsyncpa [#allocation11], 0 }
  0x18   :  { %30 = vsyncpa [#allocation14], 0 }
  0x19   :  { %31 = vsyncpa [#allocation17], 0 }
  0x1a   :  { %32 = vsyncpa [#allocation6], 0 }
  0x1b   :  { %34 = vsyncpa [#allocation6 + $0x1], 0  ;;  %s3015_s1 = smov 0   ;;  %s3017_s22 = smov 0  }
  0x1c   :  { %s3019_s23 = smov 0   ;;  %s3021_s24 = smov 0  }
  0x1d   :  { %s3023_s2 = smov 0   ;;  %s3025_s25 = smov 0  }
  0x1e LB: > { %3660 = sst [smem:[#allocation26_spill]] %s2883_s24  ;;  %s3628_s3 = sadd.s32 4294967295, %s2891_s25   ;;  %s2891_s25 = sphi %s3025_s25, %s40_s25   ;;  %s2887_s2 = sphi %s3023_s2, %s3702_s2   ;;  %s2883_s24 = sphi %s3021_s24, %s3701_s24   ;;  %s2879_s23 = sphi %s3019_s23, %s3700_s23   ;;  %s2875_s22 = sphi %s3017_s22, %s3699_s22   ;;  %s2871_s1 = sphi %s3015_s1, %s3698_s1  }
  0x1f   : > { %p2124_p0 = scmp.ge.s32.totalorder %s2891_s25, 1  ;;  %p3049_p1 = scmp.eq.s32.totalorder %s3628_s3, 0 }
  0x20   : > { %p529_p2 = scmp.lt.s32.totalorder %s2891_s25, 3  ;;  %s2893_s28 = smov [#allocation7]  }
  0x21   : > { %s3661_s26 = scalar_select %p3049_p1, 1, 0 }
  0x22   : > { %p3054_p3 = pnand %p2124_p0, %p529_p2  ;;  %s541_s4 = sshll.u32 %s2893_s28, 4  ;;  %s3058_s4 = int_to_ptr.vmem [resolvable:$true] %s541_s4 }
  0x23   : > { %s2894_s30 = smov [#allocation10]   ;;  %s2895_s21 = smov [#allocation13]  }
  0x24   : > { %s3662_s27 = scalar_select %p3054_p3, 1, 0 }
  0x25   : > { %p2391_p4 = pneg %p3054_p3  ;;  %s571_s0 = sshll.u32 %s2894_s30, 4  ;;  %s3069_s0 = int_to_ptr.vmem [resolvable:$true] %s571_s0 }
  0x26   : > { %s3071_s3 = sshll.u32 %s2895_s21, 4  ;;  %s3664_s19 = sld [smem:[#allocation31_spill]]  ;;  %s596_s3 = int_to_ptr.vmem [resolvable:$true] %s3071_s3 }
  0x27   : > { %p3065_p6 = pnand %p2391_p4, %p3049_p1 }
  0x29   : > { %p3081_p8 = pneg %p3065_p6 }
  0x2c   : > { %s2539_s18 = scalar_lea.hbm %s3664_s19, 256 }
  0x2d   : > { %p2540_p7 = scmp.ne.s32.totalorder %s3664_s19, %s2539_s18  ;;  %p2546_p11 = scmp.lt.u32.totalorder %s2539_s18, %s3664_s19 }
  0x2f   : > { %p2542_p9 = pnand %p3081_p8, %p2540_p7 }
  0x31   : > { %p2543_p10 = pneg %p2542_p9 }
  0x33   : > { %p2548_p12 = pnand %p2546_p11, %p2543_p10 }
  0x35   : > { %2551 = shalt.err (!%p2548_p12)
}
  0x36   : > { %s2552_s15 = scalar_lea.vmem %s3058_s4, 256  ;;  %p2560_p4 = scmp.lt.s32.totalorder %s3058_s4, %s3058_s4 }
  0x37   : > { %p2553_p13 = scmp.ne.s32.totalorder %s3058_s4, %s2552_s15  ;;  %p2561_p5 = scmp.lt.s32.totalorder %s2552_s15, %s2552_s15 }
  0x39   : > { %p2555_p0 = pnand %p2553_p13, %p3081_p8  ;;  %p2562_p7 = por %p2561_p5, %p2560_p4 }
  0x3b   : > { %p2556_p2 = pneg %p2555_p0 }
  0x3d   : > { %p2563_p9 = pnand %p2562_p7, %p2556_p2 }
  0x3f   : > { %2566 = shalt.err (!%p2563_p9)
}
  0x40   : > { %s3637_s17 = smov 64   ;;  %s2897_s18 = smov 4  }
  0x41   : > { %2394 = dma.hbm_to_vmem [thread:$0]  (!%p3065_p6), %s3664_s19, 256, %s3058_s4, [#allocation8], %s3637_s17, %s3637_s17, %s2897_s18  }
  0x42   : > { %s3666_s7 = sld [smem:[#allocation34_spill]] }
  0x48   : > { %s2567_s15 = scalar_lea.hbm %s3666_s7, 16 }
  0x49   : > { %p2568_p5 = scmp.ne.s32.totalorder %s3666_s7, %s2567_s15  ;;  %p2574_p12 = scmp.lt.u32.totalorder %s2567_s15, %s3666_s7 }
  0x4b   : > { %p2570_p10 = pnand %p2568_p5, %p3081_p8 }
  0x4d   : > { %p2571_p11 = pneg %p2570_p10 }
  0x4f   : > { %p2576_p13 = pnand %p2574_p12, %p2571_p11 }
  0x51   : > { %2579 = shalt.err (!%p2576_p13)
}
  0x52   : > { %s2580_s4 = scalar_lea.vmem %s3069_s0, 16  ;;  %s2587_s10 = scalar_lea.vmem %s3069_s0, 32 }
  0x53   : > { %p2581_p0 = scmp.ne.s32.totalorder %s3069_s0, %s2580_s4  ;;  %p2588_p7 = scmp.lt.s32.totalorder %s3069_s0, %s3069_s0 }
  0x54   : > { %p2589_p9 = scmp.lt.s32.totalorder %s2587_s10, %s2580_s4 }
  0x55   : > { %p2583_p2 = pnand %p2581_p0, %p3081_p8 }
  0x56   : > { %p2590_p5 = por %p2589_p9, %p2588_p7 }
  0x57   : > { %p2584_p4 = pneg %p2583_p2 }
  0x59   : > { %p2591_p10 = pnand %p2590_p5, %p2584_p4 }
  0x5b   : > { %2594 = shalt.err (!%p2591_p10)
}
  0x5c   : > { %2400 = dma.hbm_to_vmem [thread:$0]  (!%p3065_p6), %s3666_s7, 16, %s3069_s0, [#allocation11]  }
  0x5d   : > { %s3667_s9 = sld [smem:[#allocation36_spill]] }
  0x63   : > { %s2595_s28 = scalar_lea.hbm %s3667_s9, 16 }
  0x64   : > { %p2596_p11 = scmp.ne.s32.totalorder %s3667_s9, %s2595_s28  ;;  %p2602_p0 = scmp.lt.u32.totalorder %s2595_s28, %s3667_s9 }
  0x66   : > { %p2598_p12 = pnand %p2596_p11, %p3081_p8 }
  0x68   : > { %p2599_p13 = pneg %p2598_p12 }
  0x6a   : > { %p2604_p2 = pnand %p2602_p0, %p2599_p13 }
  0x6c   : > { %2607 = shalt.err (!%p2604_p2)
}
  0x6d   : > { %s2608_s10 = scalar_lea.vmem %s596_s3, 16  ;;  %s2615_s0 = scalar_lea.vmem %s596_s3, 32 }
  0x6e   : > { %p2609_p4 = scmp.ne.s32.totalorder %s596_s3, %s2608_s10  ;;  %p2616_p5 = scmp.lt.s32.totalorder %s596_s3, %s596_s3 }
  0x6f   : > { %p2617_p10 = scmp.lt.s32.totalorder %s2615_s0, %s2608_s10 }
  0x70   : > { %p2611_p7 = pnand %p2609_p4, %p3081_p8 }
  0x71   : > { %p2618_p3 = por %p2617_p10, %p2616_p5 }
  0x72   : > { %p2612_p9 = pneg %p2611_p7 }
  0x74   : > { %p2619_p1 = pnand %p2618_p3, %p2612_p9 }
  0x76   : > { %2622 = shalt.err (!%p2619_p1)
}
  0x77   : > { %2406 = dma.hbm_to_vmem [thread:$0]  (!%p3065_p6), %s3667_s9, 16, %s596_s3, [#allocation14]  }
  0x78   : > { %s2898_s24 = smov [#allocation16]   ;;  %s2899_s28 = smov [#allocation9]  }
  0x79   : > { %s620_s20 = sshll.u32 %s2898_s24, 4  ;;  %s557_s30 = sshll.u32 %s2899_s28, 4  ;;  %s621_s20 = int_to_ptr.vmem [resolvable:$true] %s620_s20  ;;  %s558_s30 = int_to_ptr.vmem [resolvable:$true] %s557_s30 }
  0x7a   : > { %s2623_s4 = scalar_lea.hbm %s3617_s12, 16 }
  0x7b   : > { %p2624_p1 = scmp.ne.s32.totalorder %s3617_s12, %s2623_s4  ;;  %p2630_p12 = scmp.lt.u32.totalorder %s2623_s4, %s3617_s12 }
  0x7d   : > { %p2626_p3 = pnand %p2624_p1, %p3081_p8 }
  0x7f   : > { %p2627_p11 = pneg %p2626_p3 }
  0x81   : > { %p2632_p13 = pnand %p2630_p12, %p2627_p11 }
  0x83   : > { %2635 = shalt.err (!%p2632_p13)
}
  0x84   : > { %s2636_s3 = scalar_lea.vmem %s621_s20, 16  ;;  %s2643_s14 = scalar_lea.vmem %s621_s20, 32 }
  0x85   : > { %p2637_p0 = scmp.ne.s32.totalorder %s621_s20, %s2636_s3  ;;  %p2644_p7 = scmp.lt.s32.totalorder %s621_s20, %s621_s20 }
  0x86   : > { %p2645_p9 = scmp.lt.s32.totalorder %s2643_s14, %s2636_s3 }
  0x87   : > { %p2639_p2 = pnand %p2637_p0, %p3081_p8 }
  0x88   : > { %p2646_p5 = por %p2645_p9, %p2644_p7 }
  0x89   : > { %p2640_p4 = pneg %p2639_p2 }
  0x8b   : > { %p2647_p10 = pnand %p2646_p5, %p2640_p4 }
  0x8d   : > { %2650 = shalt.err (!%p2647_p10)
}
  0x8e   : > { %2412 = dma.hbm_to_vmem [thread:$0]  (!%p3065_p6), %s3617_s12, 16, %s621_s20, [#allocation17]  }
  0x8f   : > { %s3668_s6 = sld [smem:[#allocation33_spill]] }
  0x95   : > { %s2651_s15 = scalar_lea.hbm %s3668_s6, 256 }
  0x96   : > { %p2652_p1 = scmp.ne.s32.totalorder %s3668_s6, %s2651_s15  ;;  %p2658_p12 = scmp.lt.u32.totalorder %s2651_s15, %s3668_s6 }
  0x98   : > { %p2654_p3 = pnand %p2652_p1, %p3081_p8 }
  0x9a   : > { %p2655_p11 = pneg %p2654_p3 }
  0x9c   : > { %p2660_p13 = pnand %p2658_p12, %p2655_p11 }
  0x9e   : > { %2663 = shalt.err (!%p2660_p13)
}
  0x9f   : > { %s2664_s3 = scalar_lea.vmem %s558_s30, 256  ;;  %p2672_p7 = scmp.lt.s32.totalorder %s558_s30, %s558_s30 }
  0xa0   : > { %p2665_p0 = scmp.ne.s32.totalorder %s558_s30, %s2664_s3  ;;  %p2673_p9 = scmp.lt.s32.totalorder %s2664_s3, %s2664_s3 }
  0xa2   : > { %p2667_p2 = pnand %p2665_p0, %p3081_p8  ;;  %p2674_p5 = por %p2673_p9, %p2672_p7 }
  0xa4   : > { %p2668_p4 = pneg %p2667_p2 }
  0xa6   : > { %p2675_p10 = pnand %p2674_p5, %p2668_p4 }
  0xa8   : > { %2678 = shalt.err (!%p2675_p10)
}
  0xa9   : > { %s3669_s20 = smov 64   ;;  %s2900_s28 = smov [#allocation12]  }
  0xaa   : > { %2397 = dma.hbm_to_vmem [thread:$0]  (!%p3065_p6), %s3668_s6, 256, %s558_s30, [#allocation8], %s3669_s20, %s3669_s20, %s2897_s18  }
  0xab   : > { %s581_s17 = sshll.u32 %s2900_s28, 4  ;;  %s2901_s21 = smov [#allocation15]   ;;  %s582_s17 = int_to_ptr.vmem [resolvable:$true] %s581_s17 }
  0xac   : > { %s609_s15 = sshll.u32 %s2901_s21, 4  ;;  %s3670_s8 = sld [smem:[#allocation35_spill]]  ;;  %s610_s15 = int_to_ptr.vmem [resolvable:$true] %s609_s15 }
  0xb2   : > { %s2679_s0 = scalar_lea.hbm %s3670_s8, 256 }
  0xb3   : > { %p2680_p1 = scmp.ne.s32.totalorder %s3670_s8, %s2679_s0  ;;  %p2686_p12 = scmp.lt.u32.totalorder %s2679_s0, %s3670_s8 }
  0xb5   : > { %p2682_p3 = pnand %p2680_p1, %p3081_p8 }
  0xb7   : > { %p2683_p11 = pneg %p2682_p3 }
  0xb9   : > { %p2688_p13 = pnand %p2686_p12, %p2683_p11 }
  0xbb   : > { %2691 = shalt.err (!%p2688_p13)
}
  0xbc   : > { %s2692_s30 = scalar_lea.vmem %s582_s17, 256  ;;  %p2700_p7 = scmp.lt.s32.totalorder %s582_s17, %s582_s17 }
  0xbd   : > { %p2693_p0 = scmp.ne.s32.totalorder %s582_s17, %s2692_s30  ;;  %p2701_p9 = scmp.lt.s32.totalorder %s2692_s30, %s2692_s30 }
  0xbf   : > { %p2695_p2 = pnand %p2693_p0, %p3081_p8  ;;  %p2702_p5 = por %p2701_p9, %p2700_p7 }
  0xc1   : > { %p2696_p4 = pneg %p2695_p2 }
  0xc3   : > { %p2703_p10 = pnand %p2702_p5, %p2696_p4 }
  0xc5   : > { %2706 = shalt.err (!%p2703_p10)
}
  0xc6   : > { %2403 = dma.hbm_to_vmem [thread:$0]  (!%p3065_p6), %s3670_s8, 256, %s582_s17, [#allocation11], %s3669_s20, %s3669_s20, %s2897_s18  }
  0xc7   : > { %s3671_s11 = sld [smem:[#allocation38_spill]] }
  0xcd   : > { %s2707_s4 = scalar_lea.hbm %s3671_s11, 16 }
  0xce   : > { %p2708_p1 = scmp.ne.s32.totalorder %s3671_s11, %s2707_s4  ;;  %p2714_p12 = scmp.lt.u32.totalorder %s2707_s4, %s3671_s11 }
  0xd0   : > { %p2710_p3 = pnand %p2708_p1, %p3081_p8 }
  0xd2   : > { %p2711_p11 = pneg %p2710_p3 }
  0xd4   : > { %p2716_p13 = pnand %p2714_p12, %p2711_p11 }
  0xd6   : > { %2719 = shalt.err (!%p2716_p13)
}
  0xd7   : > { %s2720_s14 = scalar_lea.vmem %s610_s15, 16  ;;  %s2727_s18 = scalar_lea.vmem %s610_s15, 32 }
  0xd8   : > { %p2721_p0 = scmp.ne.s32.totalorder %s610_s15, %s2720_s14  ;;  %p2728_p7 = scmp.lt.s32.totalorder %s610_s15, %s610_s15 }
  0xd9   : > { %p2729_p9 = scmp.lt.s32.totalorder %s2727_s18, %s2720_s14 }
  0xda   : > { %p2723_p2 = pnand %p2721_p0, %p3081_p8 }
  0xdb   : > { %p2730_p5 = por %p2729_p9, %p2728_p7 }
  0xdc   : > { %p2724_p4 = pneg %p2723_p2 }
  0xde   : > { %p2731_p10 = pnand %p2730_p5, %p2724_p4 }
  0xe0   : > { %2734 = shalt.err (!%p2731_p10)
}
  0xe1   : > { %2409 = dma.hbm_to_vmem [thread:$0]  (!%p3065_p6), %s3671_s11, 16, %s610_s15, [#allocation14]  }
  0xe2   : > { %s2902_s30 = smov [#allocation18]   ;;  %s2735_s21 = scalar_lea.hbm %s3618_s13, 16 }
  0xe3   : > { %s631_s7 = sshll.u32 %s2902_s30, 4  ;;  %p2736_p1 = scmp.ne.s32.totalorder %s3618_s13, %s2735_s21  ;;  %s632_s7 = int_to_ptr.vmem [resolvable:$true] %s631_s7 }
  0xe4   : > { %p2742_p12 = scmp.lt.u32.totalorder %s2735_s21, %s3618_s13 }
  0xe5   : > { %p2738_p3 = pnand %p2736_p1, %p3081_p8 }
  0xe7   : > { %p2739_p11 = pneg %p2738_p3 }
  0xe9   : > { %p2744_p13 = pnand %p2742_p12, %p2739_p11 }
  0xeb   : > { %2747 = shalt.err (!%p2744_p13)
}
  0xec   : > { %s2748_s15 = scalar_lea.vmem %s632_s7, 16  ;;  %s2755_s3 = scalar_lea.vmem %s632_s7, 32 }
  0xed   : > { %p2749_p0 = scmp.ne.s32.totalorder %s632_s7, %s2748_s15  ;;  %p2756_p7 = scmp.lt.s32.totalorder %s632_s7, %s632_s7 }
  0xee   : > { %p2757_p9 = scmp.lt.s32.totalorder %s2755_s3, %s2748_s15 }
  0xef   : > { %p2751_p2 = pnand %p2749_p0, %p3081_p8 }
  0xf0   : > { %p2758_p5 = por %p2757_p9, %p2756_p7 }
  0xf1   : > { %p2752_p4 = pneg %p2751_p2 }
  0xf3   : > { %p2759_p10 = pnand %p2758_p5, %p2752_p4 }
  0xf5   : > { %2762 = shalt.err (!%p2759_p10)
}
  0xf6   : > { %2415 = dma.hbm_to_vmem [thread:$0]  (!%p3065_p6), %s3618_s13, 16, %s632_s7, [#allocation17]  }
  0xf7   : > { %s2123_s16 = sadd.s32 4294967294, %s2891_s25   ;;  %s52_s20 = sadd.s32 1, %s2887_s2 }
  0xf8   : > { %p54_p8 = scmp.ge.s32.totalorder %s52_s20, 2  ;;  %s141_s29 = sadd.s32 1, %s2879_s23 }
  0xf9   : > { %p148_p1 = scmp.ne.s32.totalorder %s2879_s23, %s2875_s22  ;;  %p149_p3 = scmp.eq.s32.totalorder %s2891_s25, 0 }
  0xfa   : > { %s3704_s20 = smov (%p54_p8, %s52_s20), 0  ;;  %p154_p12 = scmp.ne.s32.totalorder %s2875_s22, %s2871_s1 }
  0xfb   : > { %p3252_p11 = por %p149_p3, %p148_p1  ;;  %s136_s30 = ssub.s32 %s2887_s2, %s3704_s20 }
  0xfc   : > { %s3673_s7 = sadd.s32 4294967295, %s2891_s25   ;;  %p139_p13 = scmp.eq.s32.totalorder %s136_s30, 0 }
  0xfd   : > { %p516_p6 = scmp.eq.s32.totalorder %s3673_s7, 1  ;;  %p3674_p0 = scmp.ne.s32.totalorder %s3661_s26, 0 }
  0xfe   : > { %p522_p7 = scmp.eq.s32.totalorder %s2123_s16, 1  ;;  %p2432_p5 = scmp.lt.s32.totalorder %s2891_s25, 2 }
  0xff   : > { %p3264_p2 = por %p3674_p0, %p154_p12  ;;  %p3268_p4 = por %p516_p6, %p148_p1 }
 0x100   : > { %s3273_s21 = scalar_select %p139_p13, %s2879_s23, %s141_s29  }
 0x101   : > { %s3676_s28 = scalar_select %p3268_p4, 1, 0 }
 0x102   : > { %p3275_p9 = por %p522_p7, %p154_p12  ;;  %s684_s10 = sand.u32 1, %s2879_s23  }
 0x103   : > { %s2135_s0 = sshll.u32 %s2887_s2, 7  ;;  %s2134_s5 = sshll.u32 %s684_s10, 3 }
 0x104   : > { %s3677_s4 = scalar_select %p3275_p9, 1, 0 }
 0x105   : > { %s3678_s14 = sld [smem:[#allocation30_spill]]  ;;  %s688_s16 = scalar_lea.vmem [#allocation4], %s2134_s5 }
 0x106   : > { %s696_s29 = sshll.u32 %s688_s16, 4  ;;  %p3289_p10 = pnand %p2432_p5, %p3252_p11  ;;  %s3293_s29 = int_to_ptr.vmem [resolvable:$true] %s696_s29 }
 0x107   : > { %s685_s7 = scalar_lea.sflag [#allocation5], %s684_s10 }
 0x108   : > { %p2765_p1 = pneg %p3289_p10 }
 0x10b   : > { %s3285_s18 = scalar_lea.hbm %s3678_s14, %s2135_s0  ;;  %s2768_s17 = scalar_lea.hbm %s3678_s14, 256 }
 0x10c   : > { %s2763_s6 = scalar_lea.hbm %s3285_s18, 128  ;;  %p2769_p11 = scmp.lt.u32.totalorder %s3285_s18, %s3678_s14 }
 0x10d   : > { %p2764_p8 = scmp.ne.s32.totalorder %s3285_s18, %s2763_s6  ;;  %p2770_p6 = scmp.lt.u32.totalorder %s2768_s17, %s2763_s6 }
 0x10e   : > { %p2772_p0 = scmp.lt.u32.totalorder %s2763_s6, %s3285_s18 }
 0x10f   : > { %p2766_p3 = pnand %p2765_p1, %p2764_p8  ;;  %p2771_p13 = por %p2770_p6, %p2769_p11 }
 0x111   : > { %p2767_p12 = pneg %p2766_p3  ;;  %p2773_p7 = por %p2772_p0, %p2771_p13 }
 0x113   : > { %p2774_p5 = pnand %p2773_p7, %p2767_p12 }
 0x115   : > { %2777 = shalt.err (!%p2774_p5)
}
 0x116   : > { %s2778_s10 = scalar_lea.vmem %s3293_s29, 128  ;;  %s2903_s16 = smov [#allocation4]  }
 0x117   : > { %p2779_p8 = scmp.ne.s32.totalorder %s3293_s29, %s2778_s10  ;;  %s2783_s0 = sshll.u32 %s2903_s16, 4  ;;  %s2784_s0 = int_to_ptr.vmem [resolvable:$false] %s2783_s0 }
 0x118   : > { %s2785_s5 = scalar_lea.vmem %s2784_s0, 256  ;;  %p2786_p4 = scmp.lt.s32.totalorder %s3293_s29, %s2784_s0 }
 0x119   : > { %p2781_p3 = pnand %p2779_p8, %p2765_p1  ;;  %p2787_p11 = scmp.lt.s32.totalorder %s2785_s5, %s2778_s10 }
 0x11b   : > { %p2782_p9 = pneg %p2781_p3  ;;  %p2788_p6 = por %p2787_p11, %p2786_p4 }
 0x11d   : > { %p2789_p13 = pnand %p2788_p6, %p2782_p9 }
 0x11f   : > { %2792 = shalt.err (!%p2789_p13)
}
 0x120   : > { %2419 = dma.hbm_to_vmem [thread:$0]  (!%p3289_p10), %s3285_s18, 128, %s3293_s29, %s685_s7  }
 0x121   : > { %p3680_p12 = scmp.ne.s32.totalorder %s3662_s27, 0 }
 0x122   : > { %s3323_s6 = sand.u32 (!%p3680_p12), 1, %s2875_s22  }
 0x123   : > { %705 = sbr.rel (%p3680_p12) target bundleno = 4000 (0xfa0), region = 100  ;;  %s2137_s17 = sshll.u32 (!%p3680_p12), %s3323_s6, 3 }
 0x124   : > { %s708_s15 = scalar_lea.sflag (!%p3680_p12), [#allocation5], %s3323_s6  ;;  %s3329_s3 = scalar_lea.vmem (!%p3680_p12), [#allocation4], %s2137_s17 }
 0x12a   : > { %2846 = dma.done.wait (%p3264_p2), %s708_s15, 128  }
 0x12b   : > { %2848 = vsyncadd (%p3264_p2), %s708_s15, 4294967168  ;;  %p3681_p4 = scmp.ne.s32.totalorder %s3661_s26, 0 }
 0x12d   : > { %2850 = dma.done.wait (%p3681_p4), [#allocation8], 512  }
 0x12e   : > { %2852 = vsyncadd (%p3681_p4), [#allocation8], 4294966784 }
 0x12f   : > { %2854 = dma.done.wait (%p3681_p4), [#allocation11], 272  }
 0x130   : > { %2856 = vsyncadd (%p3681_p4), [#allocation11], 4294967024 }
 0x131   : > { %2858 = dma.done.wait (%p3681_p4), [#allocation14], 32  }
 0x132   : > { %2860 = vsyncadd (%p3681_p4), [#allocation14], 4294967264 }
 0x133   : > { %2862 = dma.done.wait (%p3681_p4), [#allocation17], 32  }
 0x134   : > { %2864 = vsyncadd (%p3681_p4), [#allocation17], 4294967264  ;;  %s3682_s27 = sld [smem:[#allocation26_spill]]  ;;  %v2904_v0 = vmov 0.0   ;;  %vm2905_vm0 = vmmov 0   ;;  %s3683_s30 = sld [smem:[#allocation28_spill]] }
 0x135   : > { %2239 = vmatprep.subr.bf16.mxu1 %v2904_v0  ;;  %2243 = vmatprep.mubr.msk.bf16.mxu1 %vm2905_vm0, %v2904_v0  ;;  %v2505_v1 = vld [vmem:[#allocation9] sm:$0xff]   ;;  %v2506_v2 = vld [vmem:[#allocation9 + $0x8] sm:$0xff]   ;;  %s3684_s0 = sld [smem:[#allocation27_spill]]  ;;  %v2507_v4 = vld [vmem:[#allocation7] sm:$0xff]   ;;  %vm864_vm1 = vcmask 261120   ;;  %s3685_s26 = sld [smem:[#allocation29_spill]] }
 0x136   : > { %2255 = vmatprep.subr.bf16.mxu0 %v2904_v0  ;;  %2259 = vmatprep.mubr.msk.bf16.mxu0 %vm2905_vm0, %v2904_v0  ;;  %v2508_v5 = vld [vmem:[#allocation7 + $0x8] sm:$0xff]   ;;  %v2150_v13 = vld [vmem:[#allocation10] ss:$0 sm:$0xff]  ;;  %vm975_vm2 = vcmask 257024   ;;  %vm1050_vm3 = vcmask 64512   ;;  %s2906_s10 = smov 120  }
 0x137   : > { %2240 = vmatpush3.bf16.msra.mxu1 %v2505_v1  ;;  %2256 = vmatpush3.bf16.msra.mxu0 %v2507_v4  ;;  %v2509_v9 = vld [vmem:[#allocation12] sm:$0xff]   ;;  %v2510_v10 = vld [vmem:[#allocation12 + $0x8] sm:$0xff]   ;;  %v2154_v30 = vld [vmem:[#allocation13] ss:$0 sm:$0xff]  ;;  %vm1112_vm4 = vcmask 1043456   ;;  %s3688_s16 = sld [smem:[#allocation39_spill]] }
 0x138   : > { %2241 = vmatprep.subr.bf16.mxu1 %v2904_v0  ;;  %2257 = vmatprep.subr.bf16.mxu0 %v2904_v0  ;;  %v3419_v42 = vld [vmem:[%s3329_s3] sm:$0xff]  ;;  %s2907_s3 = smov 112   ;;  %vm1837_vm5 = vcmask 523264   ;;  %s3694_s9 = sld [smem:[#allocation45_spill]] }
 0x139   : > { %p3695_p10 = scmp.ne.s32.totalorder %s3676_s28, 0 }
 0x13a   : > { %p815_p2 = scmp.lt.s32.totalorder %s3682_s27, 1 }
 0x13b   : > { %2242 = vmatpush3.bf16.msra.mxu1 %v2506_v2  ;;  %2258 = vmatpush3.bf16.msra.mxu0 %v2508_v5 }
 0x13c   : > { %s816_s24 = scalar_select %p815_p2, %s3682_s27, 1  ;;  %2247 = vmatprep.subr.bf16.mxu1 %v2904_v0  ;;  %2269 = vmatprep.subr.bf16.mxu0 %v2904_v0 }
 0x13e   : > { %s3359_s18 = sshll.u32 %s816_s24, 3 }
 0x13f   : > { %s825_s7 = scalar_lea.vmem %s3683_s30, %s3359_s18  ;;  %s821_s5 = scalar_lea.vmem %s3684_s0, %s3359_s18 }
 0x140   : > { %v837_v3 = vld [vmem:[%s825_s7] sm:$0xff]  ;;  %s829_s29 = scalar_lea.vmem %s3685_s26, %s3359_s18  ;;  %s3686_s7 = sld [smem:[#allocation32_spill]] }
 0x141   : > { %v3370_v6 = vld [vmem:[%s821_s5] sm:$0xff]  ;;  %v838_v7 = vpack.c.bf16 %v837_v3, %v837_v3  ;;  %s3687_s5 = sld [smem:[#allocation37_spill]]  ;;  %s2908_s26 = smov 104  }
 0x142   : > { %v979_v8 = vpack.c.bf16 %v3370_v6, %v3370_v6  ;;  %v839_v11 = vld [vmem:[%s829_s29] sm:$0xff]  ;;  %s3689_s29 = sld [smem:[#allocation41_spill]]  ;;  %s3692_s0 = sld [smem:[#allocation43_spill]] }
 0x143   : > { %2244 = vmatmul.mubr.msk.bf16.vlgmr.msra.gmra.mrb[0].mxu1 %vm864_vm1, %v838_v7  ;;  %v840_v12 = vpack.c.bf16 %v839_v11, %v839_v11  ;;  %s2195_s18 = sshll.u32 %s3682_s27, 7  ;;  %s814_s30 = scalar_lea.vmem [#allocation19], %s2137_s17 }
 0x144   : > { %2251 = vmatprep.mubr.msk.bf16.mxu1 %vm2905_vm0, %v2904_v0  ;;  %2260 = vmatmul.mubr.msk.bf16.vlgmr.msra.gmra.mrb[0].mxu0 %vm864_vm1, %v979_v8  ;;  %s3555_s11 = scalar_lea.hbm %s3694_s9, %s2195_s18  ;;  %s2909_s17 = smov [#allocation19]  }
 0x145   : > { %2271 = vmatprep.mubr.msk.bf16.mxu0 %vm2905_vm0, %v2904_v0  ;;  %2248 = vmatpush3.bf16.msra.mxu1 %v2509_v9  ;;  %s2797_s27 = sshll.u32 %s2909_s17, 4  ;;  %s2798_s27 = int_to_ptr.vmem [resolvable:$false] %s2797_s27 }
 0x146   : > { %2249 = vmatprep.subr.bf16.mxu1 %v2904_v0  ;;  %v2158_v24 = vld [vmem:[%s3686_s7] ss:$0 sm:$0xff]  ;;  %s3691_s7 = sld [smem:[#allocation42_spill]] }
 0x147   : > { %v2168_v8 = vld [vmem:[%s3687_s5 + $0x4] sm:$0xf] }
 0x148   : > { %v1282_v9 = vsel %vm1112_vm4, %v2168_v8, 0 }
 0x149   : > { %2250 = vmatpush3.bf16.msra.mxu1 %v2510_v10 }
 0x14a   : > { %2263 = vmatprep.subr.bf16.mxu1 %v2904_v0 }
 0x14c   : > { %2252 = vmatmul.mubr.msk.bf16.vlgmr.msra.gmra.mrb[4].mxu1 %vm864_vm1, %v840_v12 }
 0x14d   : > { %2265 = vmatprep.mubr.msk.bf16.mxu1 %vm2905_vm0, %v2904_v0 }
 0x216   : > { %v902_v14 = vpop.f32.mrb[0].mxu1 }
 0x217   : > { %v903_v15 = vadd.f32 %v2150_v13, %v902_v14  ;;  %v2245_v16 = vpop.f32.mrb[1].mxu1  ;;  %v1041_v20 = vpop.f32.mrb[0].mxu0  ;;  %v1157_v14 = vld [vmem:[%s3687_s5] sm:$0xf] }
 0x218   : > { %v905_v17 = vpop.f32.mrb[2].mxu1  ;;  %v2261_v21 = vpop.f32.mrb[1].mxu0  ;;  %v1042_v28 = vadd.f32 %v2158_v24, %v1041_v20 }
 0x219   : > { %v974_v18 = vpack.c.bf16 %v903_v15, %v903_v15  ;;  %v2246_v19 = vpop.f32.mrb[3].mxu1  ;;  %v1044_v22 = vpop.f32.mrb[2].mxu0  ;;  %v1328_v17 = vsel %vm1112_vm4, %v1157_v14, 0 }
 0x21a   : > { %v2262_v23 = vpop.f32.mrb[3].mxu0  ;;  %v3402_v29 = vpack.c.bf16 %v1042_v28, %v1042_v28 }
 0x21b   : > { %976 = vst.msk [vmem:[#allocation2] sm:$0xf] %vm975_vm2, %v974_v18 }
 0x21f   : > { %v968_v31 = vpop.f32.mrb[4].mxu1 }
 0x220   : > { %v969_v32 = vadd.f32 %v2154_v30, %v968_v31  ;;  %v2253_v33 = vpop.f32.mrb[5].mxu1 }
 0x221   : > { %v971_v34 = vpop.f32.mrb[6].mxu1 }
 0x222   : > { %v1048_v25 = vld [vmem:[#allocation2] sm:$0xf]  ;;  %v977_v35 = vpack.c.bf16 %v969_v32, %v969_v32  ;;  %v2254_v36 = vpop.f32.mrb[7].mxu1 }
 0x223   : > { %v1055_v26 = vsel %vm1050_vm3, %v1048_v25, 0  ;;  %v3397_v27 = vcombine.low %v1048_v25, %v1048_v25 }
 0x224   : > { %2264 = vmatpush3.bf16.xpose.msra.mxu1 %v1055_v26  ;;  %978 = vst.msk [vmem:[#allocation3] sm:$0xf] %vm975_vm2, %v977_v35 }
 0x225   : > { %1164 = vrot.lane.b32.xlu0 %v3397_v27, %s2906_s10  ;;  %2275 = vmatprep.subr.bf16.mxu1 %v2904_v0 }
 0x229   : > { %1159 = vrot.lane.b32.xlu0 %v3402_v29, %s2906_s10 }
 0x22b   : > { %2266 = vmatmul.mubr.msk.bf16.vlgmr.msra.gmra.mrb[8].mxu1 %vm1050_vm3, %v3402_v29  ;;  %v1049_v37 = vld [vmem:[#allocation3] sm:$0xf] }
 0x22c   : > { %2277 = vmatprep.mubr.msk.bf16.mxu1 %vm2905_vm0, %v2904_v0  ;;  %v1114_v38 = vsel %vm1112_vm4, %v1049_v37, 0  ;;  %v3426_v60 = vcombine.low %v1049_v37, %v1049_v37 }
 0x22d   : > { %2270 = vmatpush3.bf16.msra.mxu0 %v1114_v38 }
 0x22e   : > { %2281 = vmatprep.subr.bf16.mxu0 %v2904_v0 }
 0x297   : > { %v1165_v39 = vpop.permute.xlu0 %1164 }
 0x298   : > { %v1170_v40 = vsel %vm1050_vm3, %v1165_v39, 0 }
 0x299   : > { %2276 = vmatpush3.bf16.xpose.msra.mxu1 %v1170_v40 }
 0x29a   : > { %2287 = vmatprep.subr.bf16.mxu1 %v2904_v0 }
 0x29b   : > { %v1160_v41 = vpop.permute.xlu0 %1159 }
 0x2a0   : > { %2278 = vmatmul.mubr.msk.bf16.vlgmr.msra.gmra.mrb[12].mxu1 %vm1050_vm3, %v1160_v41 }
 0x2a1   : > { %2289 = vmatprep.mubr.msk.bf16.mxu1 %vm2905_vm0, %v2904_v0  ;;  %2288 = vmatpush3.bf16.msra.mxu1 %v1282_v9 }
 0x2a2   : > { %2299 = vmatprep.subr.bf16.mxu1 %v2904_v0 }
 0x2fe   : > { %v1091_v43 = vpop.f32.mrb[8].mxu1 }
 0x2ff   : > { %v1092_v44 = vadd.f32 %v1091_v43, %v3419_v42  ;;  %v2267_v45 = vpop.f32.mrb[9].mxu1 }
 0x300   : > { %v1094_v46 = vpop.f32.mrb[10].mxu1 }
 0x301   : > { %v2268_v47 = vpop.f32.mrb[11].mxu1  ;;  %v1097_v48 = vsel %vm1050_vm3, %v1092_v44, -inf }
 0x302   : > { %1098 = vmax.xlane.f32.xlu1 %v1097_v48 }
 0x373   : > { %v1206_v49 = vpop.f32.mrb[12].mxu1 }
 0x374   : > { %v1207_v50 = vadd.f32 %v1206_v49, %v3419_v42  ;;  %v2279_v51 = vpop.f32.mrb[13].mxu1 }
 0x375   : > { %v1209_v52 = vpop.f32.mrb[14].mxu1 }
 0x376   : > { %v2280_v53 = vpop.f32.mrb[15].mxu1  ;;  %v1212_v54 = vsel %vm1050_vm3, %v1207_v50, -inf }
 0x377   : > { %1213 = vmax.xlane.f32.xlu1 %v1212_v54 }
 0x38f   : > { %v1099_v55 = vpop.xlane.xlu1 %1098 }
 0x390   : > { %v1100_v56 = vsub.f32 %v1092_v44, %v1099_v55 }
 0x392   : > { %v1101_v57 = vmul.f32 1.442695, %v1100_v56 }
 0x394   : > { %2519 = vpow2.f32 %v1101_v57 }
 0x39e   : > { %v2520_v58 = vpop.eup %2519 }
 0x39f   : > { %v1103_v59 = vsel %vm1050_vm3, %v2520_v58, 0.0 }
 0x3a0   : > { %1104 = vadd.xlane.f32.xlu0 %v1103_v59 }
 0x3b6   : > { %1432 = vrot.lane.b32.xlu0 %v3426_v60, %s2907_s3 }
 0x404   : > { %v1214_v61 = vpop.xlane.xlu1 %1213 }
 0x405   : > { %v1215_v62 = vsub.f32 %v1207_v50, %v1214_v61 }
 0x407   : > { %v1216_v63 = vmul.f32 1.442695, %v1215_v62 }
 0x409   : > { %2521 = vpow2.f32 %v1216_v63 }
 0x413   : > { %v2522_v1 = vpop.eup %2521 }
 0x414   : > { %v1218_v2 = vsel %vm1050_vm3, %v2522_v1, 0.0 }
 0x415   : > { %1219 = vadd.xlane.f32.xlu1 %v1218_v2 }
 0x426   : > { %1227 = vrot.lane.b32.xlu1 %v3426_v60, %s2906_s10  ;;  %s1913_s10 = scalar_lea.sflag [#allocation6], %s3323_s6 }
 0x42a   : > { %1372 = vrot.lane.b32.xlu1 %v3397_v27, %s2907_s3 }
 0x42d   : > { %v1105_v3 = vpop.xlane.xlu0 %1104 }
 0x42e   : > { %2523 = vrcp.f32 %v1105_v3  ;;  %1370 = vrot.lane.b32.xlu1 %v3402_v29, %s2907_s3 }
 0x431   : > { %v1433_v18 = vpop.permute.xlu0 %1432 }
 0x432   : > { %v1438_v23 = vsel %vm1112_vm4, %v1433_v18, 0 }
 0x438   : > { %v2524_v4 = vpop.eup %2523 }
 0x439   : > { %v1107_v5 = vmul.f32 %v2524_v4, %v2520_v58 }
 0x43b   : > { %v1108_v7 = vpack.c.bf16 %v1107_v5, %v1107_v5 }
 0x43d   : > { %2272 = vmatmul.mubr.msk.bf16.vlgmr.msra.gmra.mrb[4].mxu0 %vm1050_vm3, %v1108_v7 }
 0x43e   : > { %2283 = vmatprep.mubr.msk.bf16.mxu0 %vm2905_vm0, %v2904_v0 }
 0x4a2   : > { %v1220_v10 = vpop.xlane.xlu1 %1219 }
 0x4a3   : > { %2525 = vrcp.f32 %v1220_v10 }
 0x4a6   : > { %v1228_v11 = vpop.permute.xlu1 %1227 }
 0x4a7   : > { %v1233_v12 = vsel %vm1112_vm4, %v1228_v11, 0 }
 0x4a8   : > { %2282 = vmatpush3.bf16.msra.mxu0 %v1233_v12 }
 0x4a9   : > { %2293 = vmatprep.subr.bf16.mxu0 %v2904_v0 }
 0x4aa   : > { %v1373_v25 = vpop.permute.xlu1 %1372 }
 0x4ab   : > { %v1378_v32 = vsel %vm1050_vm3, %v1373_v25, 0 }
 0x4ad   : > { %v2526_v13 = vpop.eup %2525 }
 0x4ae   : > { %v1222_v15 = vmul.f32 %v2526_v13, %v2522_v1  ;;  %v1371_v34 = vpop.permute.xlu1 %1370 }
 0x4b0   : > { %v1223_v16 = vpack.c.bf16 %v1222_v15, %v1222_v15 }
 0x4b2   : > { %2284 = vmatmul.mubr.msk.bf16.vlgmr.msra.gmra.mrb[8].mxu0 %vm1050_vm3, %v1223_v16 }
 0x4b3   : > { %2294 = vmatpush3.bf16.msra.mxu0 %v1328_v17  ;;  %2295 = vmatprep.mubr.msk.bf16.mxu0 %vm2905_vm0, %v2904_v0 }
 0x4b4   : > { %2305 = vmatprep.subr.bf16.mxu0 %v2904_v0 }
 0x510   : > { %v1150_v19 = vpop.f32.mrb[4].mxu0 }
 0x511   : > { %v1156_v20 = vpack.c.bf16 %v1150_v19, %v1150_v19  ;;  %v2273_v21 = vpop.f32.mrb[5].mxu0 }
 0x512   : > { %v1153_v22 = vpop.f32.mrb[6].mxu0 }
 0x513   : > { %v2274_v24 = vpop.f32.mrb[7].mxu0  ;;  %2296 = vmatmul.mubr.msk.bf16.vlgmr.msra.gmra.mrb[12].mxu0 %vm1050_vm3, %v1156_v20 }
 0x514   : > { %2306 = vmatpush3.bf16.msra.mxu0 %v1438_v23  ;;  %2307 = vmatprep.mubr.msk.bf16.mxu0 %vm2905_vm0, %v2904_v0 }
 0x515   : > { %2317 = vmatprep.subr.bf16.mxu0 %v2904_v0 }
 0x585   : > { %v1269_v26 = vpop.f32.mrb[8].mxu0 }
 0x586   : > { %v1275_v28 = vpack.c.bf16 %v1269_v26, %v1269_v26  ;;  %v2285_v30 = vpop.f32.mrb[9].mxu0 }
 0x587   : > { %v1272_v31 = vpop.f32.mrb[10].mxu0 }
 0x588   : > { %v2286_v33 = vpop.f32.mrb[11].mxu0  ;;  %2290 = vmatmul.mubr.msk.bf16.vlgmr.msra.gmra.mrb[16].mxu1 %vm1050_vm3, %v1275_v28 }
 0x589   : > { %2300 = vmatpush3.bf16.xpose.msra.mxu1 %v1378_v32  ;;  %2301 = vmatprep.mubr.msk.bf16.mxu1 %vm2905_vm0, %v2904_v0 }
 0x58a   : > { %2311 = vmatprep.subr.bf16.mxu1 %v2904_v0 }
 0x590   : > { %2302 = vmatmul.mubr.msk.bf16.vlgmr.msra.gmra.mrb[20].mxu1 %vm1050_vm3, %v1371_v34 }
 0x591   : > { %2313 = vmatprep.mubr.msk.bf16.mxu1 %vm2905_vm0, %v2904_v0 }
 0x5e6   : > { %v1364_v35 = vpop.f32.mrb[12].mxu0 }
 0x5e7   : > { %v2297_v36 = vpop.f32.mrb[13].mxu0 }
 0x5e8   : > { %v1367_v37 = vpop.f32.mrb[14].mxu0 }
 0x5e9   : > { %v2298_v38 = vpop.f32.mrb[15].mxu0  ;;  %v2179_v37 = vld [vmem:[#allocation15] ss:$0 sm:$0xff] }
 0x65b   : > { %v1318_v39 = vpop.f32.mrb[16].mxu1 }
 0x65c   : > { %v3465_v40 = vadd.f32 %v1364_v35, %v1318_v39  ;;  %v2291_v41 = vpop.f32.mrb[17].mxu1 }
 0x65d   : > { %v1321_v43 = vpop.f32.mrb[18].mxu1 }
 0x65e   : > { %v2292_v44 = vpop.f32.mrb[19].mxu1 }
 0x663   : > { %v1414_v45 = vpop.f32.mrb[20].mxu1 }
 0x664   : > { %v1415_v46 = vadd.f32 %v1414_v45, %v3419_v42  ;;  %v2303_v47 = vpop.f32.mrb[21].mxu1 }
 0x665   : > { %v1417_v48 = vpop.f32.mrb[22].mxu1 }
 0x666   : > { %v2304_v49 = vpop.f32.mrb[23].mxu1  ;;  %v1420_v50 = vsel %vm1050_vm3, %v1415_v46, -inf }
 0x667   : > { %1421 = vmax.xlane.f32.xlu1 %v1420_v50 }
 0x6f4   : > { %v1422_v51 = vpop.xlane.xlu1 %1421 }
 0x6f5   : > { %v1423_v52 = vsub.f32 %v1415_v46, %v1422_v51  ;;  %v2513_v51 = vld [vmem:[%s3688_s16] sm:$0xff]  }
 0x6f7   : > { %v1424_v53 = vmul.f32 1.442695, %v1423_v52  ;;  %v2514_v52 = vld [vmem:[%s3688_s16 + $0x8] sm:$0xff]  }
 0x6f9   : > { %2527 = vpow2.f32 %v1424_v53  ;;  %v2516_v53 = vld [vmem:[%s3689_s29 + $0x8] sm:$0xff]  }
 0x703   : > { %v2528_v54 = vpop.eup %2527 }
 0x704   : > { %v1426_v55 = vsel %vm1050_vm3, %v2528_v54, 0.0 }
 0x705   : > { %1427 = vadd.xlane.f32.xlu0 %v1426_v55 }
 0x71b   : > { %1532 = vrot.lane.b32.xlu0 %v3397_v27, %s2908_s26 }
 0x71f   : > { %1530 = vrot.lane.b32.xlu0 %v3402_v29, %s2908_s26  ;;  %v2173_v29 = vld [vmem:[%s3687_s5 + $0x8] sm:$0xf] }
 0x720   : > { %v1487_v63 = vsel %vm1112_vm4, %v2173_v29, 0 }
 0x721   : > { %2312 = vmatpush3.bf16.msra.mxu1 %v1487_v63  ;;  %v2517_v63 = vld [vmem:[%s3689_s29 + $0x10] sm:$0xff]  }
 0x722   : > { %2323 = vmatprep.subr.bf16.mxu1 %v2904_v0 }
 0x792   : > { %v1428_v56 = vpop.xlane.xlu0 %1427 }
 0x793   : > { %2529 = vrcp.f32 %v1428_v56 }
 0x796   : > { %v1533_v59 = vpop.permute.xlu0 %1532 }
 0x797   : > { %v1538_v62 = vsel %vm1050_vm3, %v1533_v59, 0 }
 0x79a   : > { %v1531_v27 = vpop.permute.xlu0 %1530 }
 0x79d   : > { %v2530_v57 = vpop.eup %2529 }
 0x79e   : > { %v1430_v58 = vmul.f32 %v2530_v57, %v2528_v54 }
 0x7a0   : > { %v1431_v61 = vpack.c.bf16 %v1430_v58, %v1430_v58  ;;  %v2180_v58 = vld [vmem:[#allocation16] ss:$0 sm:$0xff] }
 0x7a2   : > { %2308 = vmatmul.mubr.msk.bf16.vlgmr.msra.gmra.mrb[16].mxu0 %vm1050_vm3, %v1431_v61  ;;  %v2181_v61 = vld [vmem:[#allocation18] ss:$0 sm:$0xff] }
 0x7a3   : > { %2318 = vmatpush3.bf16.xpose.msra.mxu0 %v1538_v62  ;;  %2319 = vmatprep.mubr.msk.bf16.mxu0 %vm2905_vm0, %v2904_v0 }
 0x7a4   : > { %2329 = vmatprep.subr.bf16.mxu0 %v2904_v0 }
 0x7aa   : > { %2320 = vmatmul.mubr.msk.bf16.vlgmr.msra.gmra.mrb[20].mxu0 %vm1050_vm3, %v1531_v27 }
 0x7ab   : > { %2331 = vmatprep.mubr.msk.bf16.mxu0 %vm2905_vm0, %v2904_v0 }
 0x875   : > { %v1474_v1 = vpop.f32.mrb[16].mxu0 }
 0x876   : > { %v1480_v2 = vpack.c.bf16 %v1474_v1, %v1474_v1  ;;  %v2309_v3 = vpop.f32.mrb[17].mxu0  ;;  %v2518_v1 = vld [vmem:[%s3689_s29 + $0x18] sm:$0xff]  }
 0x877   : > { %v1477_v4 = vpop.f32.mrb[18].mxu0 }
 0x878   : > { %v2310_v5 = vpop.f32.mrb[19].mxu0  ;;  %2314 = vmatmul.mubr.msk.bf16.vlgmr.msra.gmra.mrb[24].mxu1 %vm1050_vm3, %v1480_v2 }
 0x879   : > { %2325 = vmatprep.mubr.msk.bf16.mxu1 %vm2905_vm0, %v2904_v0 }
 0x87d   : > { %v1574_v7 = vpop.f32.mrb[20].mxu0 }
 0x87e   : > { %v1575_v8 = vadd.f32 %v1574_v7, %v3419_v42  ;;  %v2321_v9 = vpop.f32.mrb[21].mxu0  ;;  %v2177_v42 = vld [vmem:[%s3687_s5 + $0xc] sm:$0xf] }
 0x87f   : > { %v1577_v10 = vpop.f32.mrb[22].mxu0  ;;  %v1647_v18 = vsel %vm1112_vm4, %v2177_v42, 0 }
 0x880   : > { %v2322_v11 = vpop.f32.mrb[23].mxu0  ;;  %v1580_v12 = vsel %vm1050_vm3, %v1575_v8, -inf  ;;  %2330 = vmatpush3.bf16.msra.mxu0 %v1647_v18 }
 0x881   : > { %1581 = vmax.xlane.f32.xlu0 %v1580_v12  ;;  %2343 = vmatprep.subr.bf16.mxu0 %v2904_v0 }
 0x90e   : > { %v1582_v13 = vpop.xlane.xlu0 %1581 }
 0x90f   : > { %v1583_v14 = vsub.f32 %v1575_v8, %v1582_v13 }
 0x911   : > { %v1584_v15 = vmul.f32 1.442695, %v1583_v14 }
 0x913   : > { %2531 = vpow2.f32 %v1584_v15 }
 0x91d   : > { %v2532_v16 = vpop.eup %2531 }
 0x91e   : > { %v1586_v17 = vsel %vm1050_vm3, %v2532_v16, 0.0 }
 0x91f   : > { %1587 = vadd.xlane.f32.xlu1 %v1586_v17 }
 0x930   : > { %1592 = vrot.lane.b32.xlu1 %v3426_v60, %s2908_s26  ;;  %s3690_s26 = sld [smem:[#allocation40_spill]] }
 0x936   : > { %v2182_v2 = vld [vmem:[%s3690_s26] ss:$0 sm:$0xff]  ;;  %s3693_s26 = sld [smem:[#allocation44_spill]] }
 0x94b   : > { %v1523_v19 = vpop.f32.mrb[24].mxu1 }
 0x94c   : > { %v1529_v20 = vadd.f32 %v1523_v19, %v3465_v40  ;;  %v2315_v21 = vpop.f32.mrb[25].mxu1 }
 0x94d   : > { %v1526_v22 = vpop.f32.mrb[26].mxu1 }
 0x94e   : > { %v2316_v23 = vpop.f32.mrb[27].mxu1 }
 0x9ac   : > { %v1588_v24 = vpop.xlane.xlu1 %1587 }
 0x9ad   : > { %2533 = vrcp.f32 %v1588_v24 }
 0x9b0   : > { %v1593_v25 = vpop.permute.xlu1 %1592 }
 0x9b1   : > { %v1598_v60 = vsel %vm1112_vm4, %v1593_v25, 0 }
 0x9b2   : > { %2324 = vmatpush3.bf16.msra.mxu1 %v1598_v60  ;;  %v2192_v60 = vld [vmem:[%s3692_s0] ss:$0 sm:$0xff]  ;;  %s2799_s0 = scalar_lea.vmem %s2798_s27, 256 }
 0x9b3   : > { %2335 = vmatprep.subr.bf16.mxu1 %v2904_v0 }
 0x9b7   : > { %v2534_v26 = vpop.eup %2533 }
 0x9b8   : > { %v1590_v28 = vmul.f32 %v2534_v26, %v2532_v16 }
 0x9ba   : > { %v1591_v30 = vpack.c.bf16 %v1590_v28, %v1590_v28  ;;  %v2193_v28 = vld [vmem:[%s3693_s26] ss:$0 sm:$0xff] }
 0x9bc   : > { %2326 = vmatmul.mubr.msk.bf16.vlgmr.msra.gmra.mrb[28].mxu1 %vm1050_vm3, %v1591_v30 }
 0x9bd   : > { %2339 = vmatprep.mubr.msk.bf16.mxu1 %vm2905_vm0, %v2904_v0  ;;  %2336 = vmatpush3.bf16.msra.mxu1 %v2513_v51 }
 0x9be   : > { %2337 = vmatprep.subr.bf16.mxu1 %v2904_v0 }
 0x9c1   : > { %2338 = vmatpush3.bf16.msra.mxu1 %v2514_v52 }
 0xa8f   : > { %v1634_v31 = vpop.f32.mrb[28].mxu1 }
 0xa90   : > { %v1640_v32 = vpack.c.bf16 %v1634_v31, %v1634_v31  ;;  %v2327_v33 = vpop.f32.mrb[29].mxu1 }
 0xa91   : > { %v1637_v34 = vpop.f32.mrb[30].mxu1 }
 0xa92   : > { %v2328_v35 = vpop.f32.mrb[31].mxu1  ;;  %2332 = vmatmul.mubr.msk.bf16.vlgmr.msra.gmra.mrb[24].mxu0 %vm1050_vm3, %v1640_v32 }
 0xa93   : > { %2351 = vmatprep.mubr.msk.bf16.mxu0 %vm2905_vm0, %v2904_v0 }
 0xb65   : > { %v1683_v36 = vpop.f32.mrb[24].mxu0 }
 0xb66   : > { %v1689_v38 = vadd.f32 %v1683_v36, %v1529_v20  ;;  %v2333_v39 = vpop.f32.mrb[25].mxu0 }
 0xb67   : > { %v1686_v40 = vpop.f32.mrb[26].mxu0 }
 0xb68   : > { %v1697_v41 = vadd.f32 %v2179_v37, %v1689_v38  ;;  %v2334_v43 = vpop.f32.mrb[27].mxu0 }
 0xb6a   : > { %v1698_v44 = vadd.f32 %v1697_v41, %v3370_v6  ;;  %v2515_v6 = vld [vmem:[%s3689_s29] sm:$0xff]  }
 0xb6b   : > { %2344 = vmatpush3.bf16.msra.mxu0 %v2515_v6 }
 0xb6c   : > { %v1701_v45 = vsel %vm864_vm1, %v1698_v44, 0.0  ;;  %2345 = vmatprep.subr.bf16.mxu0 %v2904_v0 }
 0xb6d   : > { %1702 = vadd.xlane.f32.xlu1 %v1701_v45 }
 0xb6f   : > { %2346 = vmatpush3.bf16.msra.mxu0 %v2516_v53 }
 0xb70   : > { %2347 = vmatprep.subr.bf16.mxu0 %v2904_v0 }
 0xb73   : > { %2348 = vmatpush3.bf16.msra.mxu0 %v2517_v63 }
 0xb74   : > { %2349 = vmatprep.subr.bf16.mxu0 %v2904_v0  ;;  %v2186_v0 = vld [vmem:[%s3691_s7] ss:$0 sm:$0xff]  ;;  %s1927_s7 = sshll.u32 %s814_s30, 4  ;;  %s3557_s7 = int_to_ptr.vmem [resolvable:$true] %s1927_s7 }
 0xb75   : > { %s2793_s3 = scalar_lea.vmem %s3557_s7, 128  ;;  %p2800_p7 = scmp.lt.s32.totalorder %s3557_s7, %s2798_s27 }
 0xb76   : > { %p2794_p9 = scmp.ne.s32.totalorder %s3557_s7, %s2793_s3  ;;  %p2801_p5 = scmp.lt.s32.totalorder %s2799_s0, %s2793_s3 }
 0xb77   : > { %2350 = vmatpush3.bf16.msra.mxu0 %v2518_v1 }
 0xb78   : > { %p2795_p1 = pnand %p2794_p9, %p3695_p10  ;;  %p2802_p8 = por %p2801_p5, %p2800_p7 }
 0xb7a   : > { %p2796_p0 = pneg %p2795_p1 }
 0xb7c   : > { %p2803_p3 = pnand %p2802_p8, %p2796_p0 }
 0xbfa   : > { %v1703_v46 = vpop.xlane.xlu1 %1702 }
 0xbfb   : > { %v1705_v47 = vmul.f32 0.03125, %v1703_v46 }
 0xbfd   : > { %v1706_v48 = vsub.f32 %v1698_v44, %v1705_v47 }
 0xbff   : > { %v1707_v49 = vmul.f32 %v1706_v48, %v1706_v48 }
 0xc01   : > { %v1708_v50 = vsel %vm864_vm1, %v1707_v49, 0.0 }
 0xc02   : > { %1709 = vadd.xlane.f32.xlu0 %v1708_v50 }
 0xc8f   : > { %v1710_v54 = vpop.xlane.xlu0 %1709 }
 0xc90   : > { %v1711_v55 = vmul.f32 0.03125, %v1710_v54 }
 0xc92   : > { %v1712_v56 = vadd.f32 1e-06, %v1711_v55 }
 0xc94   : > { %2535 = vrsqrt.f32 %v1712_v56 }
 0xc9e   : > { %v2536_v57 = vpop.eup %2535 }
 0xc9f   : > { %v1714_v59 = vmul.f32 %v2536_v57, %v1706_v48 }
 0xca1   : > { %v1721_v62 = vmul.f32 %v2180_v58, %v1714_v59 }
 0xca3   : > { %v1728_v27 = vadd.f32 %v2181_v61, %v1721_v62 }
 0xca5   : > { %v1729_v29 = vpack.c.bf16 %v1728_v27, %v1728_v27 }
 0xca7   : > { %2340 = vmatmul.mubr.msk.bf16.vlgmr.msra.gmra.mrb[32].mxu1 %vm864_vm1, %v1729_v29 }
 0xd7a   : > { %v1790_v3 = vpop.f32.mrb[32].mxu1 }
 0xd7b   : > { %v1791_v4 = vadd.f32 %v2182_v2, %v1790_v3  ;;  %v2341_v5 = vpop.f32.mrb[33].mxu1 }
 0xd7c   : > { %v1793_v7 = vpop.f32.mrb[34].mxu1 }
 0xd7d   : > { %v1796_v8 = vmax.f32 %v1791_v4, 0.0  ;;  %v2342_v9 = vpop.f32.mrb[35].mxu1 }
 0xd7f   : > { %v1797_v10 = vpack.c.bf16 %v1796_v8, %v1796_v8 }
 0xd81   : > { %2352 = vmatmul.mubr.msk.bf16.vlgmr.msra.gmra.mrb[28].mxu0 %vm1837_vm5, %v1797_v10 }
 0xe54   : > { %v1875_v11 = vpop.f32.mrb[28].mxu0 }
 0xe55   : > { %v1876_v12 = vadd.f32 %v2186_v0, %v1875_v11  ;;  %v2353_v13 = vpop.f32.mrb[29].mxu0 }
 0xe56   : > { %v1878_v14 = vpop.f32.mrb[30].mxu0 }
 0xe57   : > { %v2354_v15 = vpop.f32.mrb[31].mxu0  ;;  %v1881_v16 = vadd.f32 %v1876_v12, %v1728_v27 }
 0xe59   : > { %v1884_v17 = vsel %vm864_vm1, %v1881_v16, 0.0 }
 0xe5a   : > { %1885 = vadd.xlane.f32.xlu0 %v1884_v17 }
 0xee7   : > { %v1886_v42 = vpop.xlane.xlu0 %1885 }
 0xee8   : > { %v1887_v18 = vmul.f32 0.03125, %v1886_v42 }
 0xeea   : > { %v1888_v19 = vsub.f32 %v1881_v16, %v1887_v18 }
 0xeec   : > { %v1889_v20 = vmul.f32 %v1888_v19, %v1888_v19 }
 0xeee   : > { %v1890_v21 = vsel %vm864_vm1, %v1889_v20, 0.0 }
 0xeef   : > { %1891 = vadd.xlane.f32.xlu0 %v1890_v21 }
 0xf7c   : > { %v1892_v22 = vpop.xlane.xlu0 %1891 }
 0xf7d   : > { %v1893_v23 = vmul.f32 0.03125, %v1892_v22 }
 0xf7f   : > { %v1894_v24 = vadd.f32 1e-06, %v1893_v23 }
 0xf81   : > { %2537 = vrsqrt.f32 %v1894_v24 }
 0xf8b   : > { %v2538_v25 = vpop.eup %2537 }
 0xf8c   : > { %v1896_v26 = vmul.f32 %v2538_v25, %v1888_v19 }
 0xf8e   : > { %v1903_v30 = vmul.f32 %v2192_v60, %v1896_v26 }
 0xf90   : > { %v1910_v31 = vadd.f32 %v2193_v28, %v1903_v30 }
 0xf92   : > { %1911 = vst.msk [vmem:[%s814_s30] sm:$0xff] %vm864_vm1, %v1910_v31 }
 0xf93   : > { %2806 = shalt.err (!%p2803_p3)
}
 0xf94   : > { %s2807_s8 = scalar_lea.hbm %s3555_s11, 128  ;;  %s2811_s15 = scalar_lea.hbm %s3694_s9, 256 }
 0xf95   : > { %p2808_p11 = scmp.ne.s32.totalorder %s3555_s11, %s2807_s8  ;;  %p2812_p12 = scmp.lt.u32.totalorder %s3555_s11, %s3694_s9 }
 0xf96   : > { %p2813_p4 = scmp.lt.u32.totalorder %s2811_s15, %s2807_s8  ;;  %p2815_p9 = scmp.lt.u32.totalorder %s2807_s8, %s3555_s11 }
 0xf97   : > { %p2809_p6 = pnand %p2808_p11, %p3695_p10 }
 0xf98   : > { %p2814_p2 = por %p2813_p4, %p2812_p12 }
 0xf99   : > { %p2810_p13 = pneg %p2809_p6 }
 0xf9a   : > { %p2816_p1 = por %p2815_p9, %p2814_p2 }
 0xf9c   : > { %p2817_p0 = pnand %p2816_p1, %p2810_p13 }
 0xf9e   : > { %2820 = shalt.err (!%p2817_p0)
}
 0xf9f   : > { %2389 = dma.vmem_to_hbm [thread:$0]  (%p3695_p10), %s3557_s7, 128, %s3555_s11, %s1913_s10  }
 0xfa0 PF: > { %s1939_s18 = sand.u32 1, %s2871_s1   ;;  %p3696_p7 = scmp.ne.s32.totalorder %s3677_s4, 0 }
 0xfa1   : > { %p3697_p5 = scmp.ge.s32.totalorder %s2891_s25, 2  ;;  %s1940_s30 = scalar_lea.sflag [#allocation6], %s1939_s18 }
 0xfa3   : > { %p2421_p8 = pnand %p3697_p5, %p3696_p7 }
 0xfa5   : > { %2866 = dma.done.wait (!%p2421_p8), %s1940_s30, 128  }
 0xfa6   : > { %2868 = vsyncadd (!%p2421_p8), %s1940_s30, 4294967168  ;;  %s40_s25 = sadd.s32 1, %s2891_s25   ;;  %s3698_s1 = smov %s2875_s22 }
 0xfa7   : > { %p37_p3 = scmp.ge.s32.totalorder %s40_s25, 4   ;;  %s3699_s22 = smov %s2879_s23 }
 0xfa8   : > { %s3700_s23 = smov %s3273_s21  ;;  %s3701_s24 = smov %s2887_s2 }
 0xfa9   : > { %s3702_s2 = smov %s3704_s20  ;;  %39 = sbr.rel (!%p37_p3) target bundleno = 30 (0x1e), region = 193 }
 0xfb0   :  { %1945 = vsyncpa [#allocation5], 1 }
 0xfb1   :  { %1947 = vsyncpa [#allocation5 + $0x1], 1 }
 0xfb2   :  { %1948 = vsyncpa [#allocation8], 1 }
 0xfb3   :  { %1949 = vsyncpa [#allocation11], 1 }
 0xfb4   :  { %1950 = vsyncpa [#allocation14], 1 }
 0xfb5   :  { %1951 = vsyncpa [#allocation17], 1 }
 0xfb6   :  { %1952 = vsyncpa [#allocation6], 1 }
 0xfb7   :  { %1954 = vsyncpa [#allocation6 + $0x1], 1 }

</bundles_post_ra>
